<compile_context>
chip_gen: v7x
topology: tpu7x:2x2x1
jax: 0.10.0
libtpu: 0.0.40
codegen_flags: <defaults>
</compile_context>

<pallas_src>
import functools

import jax
import jax.numpy as jnp
from jax.experimental import pallas as pl
from jax.experimental.pallas import tpu as pltpu

EPS = 1e-5
LANE = 128

# taps paired so each accumulating matmul has K = 2*Cp (>= 256 when Cp >= 128)
TAP_GROUPS = ((0, 1), (2, 3), (4, 5), (6, 7), (8,))


def _default_vmem_limit():
    """<= 64 MiB and <= 3/4 of physical VMEM (v7x only has 64 MiB per TC)."""
    try:
        cap = pltpu.get_tpu_info().vmem_capacity_bytes
    except Exception:
        cap = 64 * 1024 * 1024
    return int(min(64 * 1024 * 1024, cap * 3 // 4))


VMEM_LIMIT = _default_vmem_limit()


# ----------------------------------------------------------------------------
# helpers
# ----------------------------------------------------------------------------
def _ceil_to(n, m):
    return ((n + m - 1) // m) * m


def _pad2d(a, rows, cols):
    r, c = a.shape
    return jnp.pad(a, ((0, rows - r), (0, cols - c)))


def _pick_tile(rows, cap=1024):
    """Largest row-tile <= cap that divides rows."""
    for tm in (1024, 512, 256, 128, 64, 32, 16, 8):
        if tm <= cap and tm <= rows and rows % tm == 0:
            return tm
    return rows


def _bn_fold(total, total_sq, count, gamma, beta):
    """Fold partial batch statistics rows into a per-channel (scale, shift)."""
    total = jnp.sum(total, axis=0, keepdims=True)        # combine sublane/core
    total_sq = jnp.sum(total_sq, axis=0, keepdims=True)  # partials on the host
    mean = total / count
    var = jnp.maximum(total_sq / count - mean * mean, 0.0)  # biased variance
    inv = jax.lax.rsqrt(var + EPS)
    scale = gamma * inv
    shift = beta - mean * scale
    return scale, shift


def _accum_stats(y, sum_ref, ssq_ref, inner_id):
    """Accumulate per-sublane (8, C) partial sums / sums-of-squares."""
    rows, cout = y.shape
    yr = y.reshape(rows // 8, 8, cout)

    @pl.when(inner_id == 0)
    def _():
        sum_ref[...] = jnp.zeros_like(sum_ref)
        ssq_ref[...] = jnp.zeros_like(ssq_ref)

    sum_ref[...] += jnp.sum(yr, axis=0)
    ssq_ref[...] += jnp.sum(yr * yr, axis=0)


# ----------------------------------------------------------------------------
# kernel 1 & 3: [optional BN-apply + ReLU] -> 1x1 conv (matmul) + batch stats
# ----------------------------------------------------------------------------
def _mm_stats_kernel(*refs, pre_act):
    if pre_act:
        x_ref, s_ref, t_ref, w_ref, y_ref, sum_ref, ssq_ref = refs
        x = jnp.maximum(x_ref[...].astype(jnp.float32) * s_ref[...] + t_ref[...],
                        0.0).astype(jnp.bfloat16)
    else:
        x_ref, w_ref, y_ref, sum_ref, ssq_ref = refs
        x = x_ref[...]                                    # already bf16
    y = jnp.dot(x, w_ref[...], preferred_element_type=jnp.float32)
    y_ref[...] = y.astype(y_ref.dtype)
    _accum_stats(y, sum_ref, ssq_ref, pl.program_id(1))


def _matmul_bn_stage(x, scale, shift, w_bf16, *, pre_act, tm, out_dtype):
    rows, cin = x.shape
    cout = w_bf16.shape[1]
    n_tiles = rows // tm
    n_par = 2 if n_tiles % 2 == 0 else 1     # megacore split (per-core stats)
    per_core = n_tiles // n_par

    kern = functools.partial(_mm_stats_kernel, pre_act=pre_act)

    x_spec = pl.BlockSpec((tm, cin), lambda c, i: (c * per_core + i, 0))
    bn_spec = pl.BlockSpec((1, cin), lambda c, i: (0, 0))
    w_spec = pl.BlockSpec((cin, cout), lambda c, i: (0, 0))

    in_specs = [x_spec] + ([bn_spec, bn_spec] if pre_act else []) + [w_spec]
    args = (x,) + ((scale, shift) if pre_act else ()) + (w_bf16,)

    return pl.pallas_call(
        kern,
        grid=(n_par, per_core),
        in_specs=in_specs,
        out_specs=[
            pl.BlockSpec((tm, cout), lambda c, i: (c * per_core + i, 0)),
            pl.BlockSpec((8, cout), lambda c, i: (c, 0)),   # resident partials
            pl.BlockSpec((8, cout), lambda c, i: (c, 0)),   # resident partials
        ],
        out_shape=[
            jax.ShapeDtypeStruct((rows, cout), out_dtype),
            jax.ShapeDtypeStruct((8 * n_par, cout), jnp.float32),
            jax.ShapeDtypeStruct((8 * n_par, cout), jnp.float32),
        ],
        compiler_params=pltpu.CompilerParams(
            dimension_semantics=("parallel", "arbitrary"),
            vmem_limit_bytes=VMEM_LIMIT),
    )(*args)


# ----------------------------------------------------------------------------
# kernel 2: BN1 + ReLU + 3x3 conv (paired-tap accumulating matmuls) + stats
# ----------------------------------------------------------------------------
def _conv2_kernel(y1_ref, s_ref, t_ref, w2_ref, y2_ref, sum_ref, ssq_ref, *,
                  H, W, cp):
    HW = H * W
    # BN1 apply + ReLU in f32, then cast to bf16 once; rolls/masks run in bf16
    hb = jnp.maximum(y1_ref[...].astype(jnp.float32) * s_ref[...] + t_ref[...],
                     0.0).astype(jnp.bfloat16)

    # boundary masks built once per grid step (hoisted out of the tap loop)
    r = jax.lax.broadcasted_iota(jnp.int32, (HW, 1), 0)
    ii = r // W
    jj = r - ii * W
    masks = []
    for k in range(9):
        dy, dx = k // 3 - 1, k % 3 - 1
        valid = ((ii + dy >= 0) & (ii + dy < H) &
                 (jj + dx >= 0) & (jj + dx < W))
        masks.append(valid.astype(jnp.bfloat16))

    def tap(k):
        dy, dx = k // 3 - 1, k % 3 - 1
        d = dy * W + dx
        tk = hb if d == 0 else pltpu.roll(hb, shift=(-d) % HW, axis=0)
        return tk * masks[k]

    # per-pair accumulating matmuls (K = 2*cp); only 2 taps live at a time
    acc = jnp.zeros((HW, cp), jnp.float32)
    for grp in TAP_GROUPS:
        if len(grp) == 1:
            lhs = tap(grp[0])
        else:
            lhs = jnp.concatenate([tap(k) for k in grp], axis=-1)
        wk = w2_ref[pl.ds(grp[0] * cp, len(grp) * cp), :]
        acc = acc + jnp.dot(lhs, wk, preferred_element_type=jnp.float32)

    y2_ref[...] = acc.astype(y2_ref.dtype)
    _accum_stats(acc, sum_ref, ssq_ref, pl.program_id(1))


def _conv2_stage(y1, scale1, shift1, w2_bf16, *, n, h, w):
    hw = h * w
    cp = y1.shape[1]
    n_par = 2 if n % 2 == 0 else 1
    per_core = n // n_par
    kern = functools.partial(_conv2_kernel, H=h, W=w, cp=cp)
    return pl.pallas_call(
        kern,
        grid=(n_par, per_core),                # one image per inner grid step
        in_specs=[
            pl.BlockSpec((hw, cp), lambda c, b: (c * per_core + b, 0)),
            pl.BlockSpec((1, cp), lambda c, b: (0, 0)),
            pl.BlockSpec((1, cp), lambda c, b: (0, 0)),
            pl.BlockSpec((9 * cp, cp), lambda c, b: (0, 0)),
        ],
        out_specs=[
            pl.BlockSpec((hw, cp), lambda c, b: (c * per_core + b, 0)),
            pl.BlockSpec((8, cp), lambda c, b: (c, 0)),
            pl.BlockSpec((8, cp), lambda c, b: (c, 0)),
        ],
        out_shape=[
            jax.ShapeDtypeStruct((n * hw, cp), jnp.bfloat16),
            jax.ShapeDtypeStruct((8 * n_par, cp), jnp.float32),
            jax.ShapeDtypeStruct((8 * n_par, cp), jnp.float32),
        ],
        compiler_params=pltpu.CompilerParams(
            dimension_semantics=("parallel", "arbitrary"),
            vmem_limit_bytes=VMEM_LIMIT),
    )(y1, scale1, shift1, w2_bf16)


# ----------------------------------------------------------------------------
# kernel 4: BN3 apply + residual add + ReLU (fully parallel over row tiles)
# ----------------------------------------------------------------------------
def _bn_residual_kernel(y_ref, s_ref, t_ref, xid_ref, o_ref):
    y = y_ref[...].astype(jnp.float32)
    o_ref[...] = jnp.maximum(
        y * s_ref[...] + t_ref[...] + xid_ref[...].astype(jnp.float32), 0.0)


def _bn_residual_stage(y3, scale3, shift3, x_id, *, tm):
    rows, cp = y3.shape
    return pl.pallas_call(
        _bn_residual_kernel,
        grid=(rows // tm,),
        in_specs=[
            pl.BlockSpec((tm, cp), lambda i: (i, 0)),
            pl.BlockSpec((1, cp), lambda i: (0, 0)),
            pl.BlockSpec((1, cp), lambda i: (0, 0)),
            pl.BlockSpec((tm, cp), lambda i: (i, 0)),
        ],
        out_specs=pl.BlockSpec((tm, cp), lambda i: (i, 0)),
        out_shape=jax.ShapeDtypeStruct((rows, cp), jnp.float32),
        compiler_params=pltpu.CompilerParams(
            dimension_semantics=("parallel",),
            vmem_limit_bytes=VMEM_LIMIT),
    )(y3, scale3, shift3, x_id)


# ----------------------------------------------------------------------------
# forward pass
# ----------------------------------------------------------------------------
def bottleneck_forward(x_nchw, p):
    n, cin, h, w = x_nchw.shape
    c = p["w1"].shape[1]
    ce = p["w3"].shape[1]
    nhw = n * h * w
    assert cin == ce, "identity path requires in_channels == expansion*out_ch"
    assert nhw % 8 == 0 and (h * w) % 8 == 0

    cin_p = _ceil_to(cin, LANE)
    cp = _ceil_to(c, LANE)
    ce_p = _ceil_to(ce, LANE)

    # NCHW -> (N*H*W, C), zero-padded to lane-dense channel width, bf16 stream
    x_flat = jnp.transpose(x_nchw, (0, 2, 3, 1)).reshape(nhw, cin)
    x_bf = _pad2d(x_flat, nhw, cin_p).astype(jnp.bfloat16)

    # lane-padded bf16 weights; conv2 reshaped to (9*Cp, Cp)
    w1 = _pad2d(p["w1"], cin_p, cp).astype(jnp.bfloat16)
    w2 = jnp.pad(p["w2"], ((0, 0), (0, cp - c), (0, cp - c))
                 ).reshape(9 * cp, cp).astype(jnp.bfloat16)
    w3 = _pad2d(p["w3"], cp, ce_p).astype(jnp.bfloat16)

    g1, be1 = _pad2d(p["g1"], 1, cp), _pad2d(p["be1"], 1, cp)
    g2, be2 = _pad2d(p["g2"], 1, cp), _pad2d(p["be2"], 1, cp)
    g3, be3 = _pad2d(p["g3"], 1, ce_p), _pad2d(p["be3"], 1, ce_p)

    tm = _pick_tile(nhw)

    # stage 1: conv1 (1x1) + batch stats
    y1, s1, q1 = _matmul_bn_stage(x_bf, None, None, w1,
                                  pre_act=False, tm=tm, out_dtype=jnp.bfloat16)
    sc1, sh1 = _bn_fold(s1, q1, nhw, g1, be1)

    # stage 2: BN1+ReLU fused into conv2 (3x3 via paired-tap matmuls) + stats
    y2, s2, q2 = _conv2_stage(y1, sc1, sh1, w2, n=n, h=h, w=w)
    sc2, sh2 = _bn_fold(s2, q2, nhw, g2, be2)

    # stage 3: BN2+ReLU fused into conv3 (1x1) + batch stats (y3 kept bf16)
    y3, s3, q3 = _matmul_bn_stage(y2, sc2, sh2, w3,
                                  pre_act=True, tm=tm, out_dtype=jnp.bfloat16)
    sc3, sh3 = _bn_fold(s3, q3, nhw, g3, be3)

    # stage 4: BN3 + identity add + ReLU
    out_pad = _bn_residual_stage(y3, sc3, sh3, x_bf, tm=tm)

    return out_pad[:, :ce].reshape(n, h, w, ce).transpose(0, 3, 1, 2)


# ----------------------------------------------------------------------------
# parameters & pure-JAX reference (for a correctness check)
# ----------------------------------------------------------------------------
def init_params(key, in_channels, out_channels, expansion=4):
    c = out_channels
    ce = out_channels * expansion
    ks = jax.random.split(key, 3)
    f32 = jnp.float32
    # NOTE: conv biases omitted -- they cancel exactly under training-mode BN.
    return {
        "w1": jax.random.normal(ks[0], (in_channels, c), f32) * 0.1,  # (Cin, C)
        "g1": jnp.ones((1, c), f32), "be1": jnp.zeros((1, c), f32),
        # conv2: torch (C_out, C_in, 3, 3) stored as (9, C_in, C_out), k=ky*3+kx
        "w2": jax.random.normal(ks[1], (9, c, c), f32) * 0.1,
        "g2": jnp.ones((1, c), f32), "be2": jnp.zeros((1, c), f32),
        "w3": jax.random.normal(ks[2], (c, ce), f32) * 0.1,           # (C, 4C)
        "g3": jnp.ones((1, ce), f32), "be3": jnp.zeros((1, ce), f32),
    }


def _reference(x_nchw, p):
    """Plain-JAX (f32) reference of the same Bottleneck forward."""
    n, cin, h, w = x_nchw.shape
    x = jnp.transpose(x_nchw, (0, 2, 3, 1))                    # NHWC

    def bn(y, g, b):
        m = jnp.mean(y, axis=(0, 1, 2), keepdims=True)
        v = jnp.mean(jnp.square(y - m), axis=(0, 1, 2), keepdims=True)
        return (y - m) * jax.lax.rsqrt(v + EPS) * g + b

    y = jnp.einsum("nhwc,cd->nhwd", x, p["w1"])
    y = jax.nn.relu(bn(y, p["g1"], p["be1"]))
    yp = jnp.pad(y, ((0, 0), (1, 1), (1, 1), (0, 0)))
    acc = 0.0
    for k in range(9):
        dy, dx = k // 3 - 1, k % 3 - 1
        acc = acc + jnp.einsum("nhwc,cd->nhwd",
                               yp[:, 1 + dy:1 + dy + h, 1 + dx:1 + dx + w, :],
                               p["w2"][k])
    y = jax.nn.relu(bn(acc, p["g2"], p["be2"]))
    y = jnp.einsum("nhwc,cd->nhwd", y, p["w3"])
    y = bn(y, p["g3"], p["be3"])
    return jnp.transpose(jax.nn.relu(y + x), (0, 3, 1, 2))


if __name__ == "__main__":
    def run_case(key, n, cin, out_ch, hw_size):
        kx, kp = jax.random.split(key)
        x = jax.random.normal(kx, (n, cin, hw_size, hw_size), jnp.float32)
        params = init_params(kp, cin, out_ch)
        out = bottleneck_forward(x, params)
        jax.block_until_ready(out)
        ref = _reference(x, params)
        assert out.shape == (n, out_ch * 4, hw_size, hw_size), out.shape
        assert bool(jnp.all(out >= 0.0))                       # final ReLU
        assert bool(jnp.all(jnp.isfinite(out)))
        assert bool(jnp.allclose(out, ref, atol=1e-1, rtol=1e-1))
        return float(jnp.mean(jnp.abs(out - ref)))

    key = jax.random.PRNGKey(0)
    k1, k2 = jax.random.split(key)

    # Bottleneck(in_channels=16, out_channels=4, i_downsample=None, stride=1):
    # identity add is valid since in_channels == expansion * out_channels.
    run_case(k1, n=2, cin=16, out_ch=4, hw_size=32)

    # moderate channel count (C=64): catches tap-masking / stats bugs that the
    # tiny (mostly-padding) case would hide; also exercises the n_par=1 path.
    mae = run_case(k2, n=2, cin=256, out_ch=64, hw_size=8)
    assert mae < 3e-2, mae

    print("KERNEL_OK")
</pallas_src>

<mosaic_0001>
module attributes {stable_mosaic.version = 11 : i64} {
  func.func @_mm_stats_kernel(%arg0: i32, %arg1: i32, %arg2: memref<1024x128xbf16, #tpu.memory_space<vmem>>, %arg3: memref<128x128xbf16, #tpu.memory_space<vmem>>, %arg4: memref<1024x128xbf16, #tpu.memory_space<vmem>>, %arg5: memref<8x128xf32, #tpu.memory_space<vmem>>, %arg6: memref<8x128xf32, #tpu.memory_space<vmem>>) attributes {dimension_semantics = [#tpu.dimension_semantics<parallel>, #tpu.dimension_semantics<arbitrary>], iteration_bounds = array<i64: 2, 1>, scalar_prefetch = 0 : i64, scratch_operands = 0 : i64, tpu.core_type = #tpu.core_type<tc>, window_params = [{transform_indices = @transform_0, window_bounds = array<i64: 1024, 128>}, {pipeline_mode = #tpu.pipeline_mode<synchronous>, transform_indices = @transform_1, window_bounds = array<i64: 128, 128>}, {transform_indices = @transform_2, window_bounds = array<i64: 1024, 128>}, {transform_indices = @transform_3, window_bounds = array<i64: 8, 128>}, {transform_indices = @transform_4, window_bounds = array<i64: 8, 128>}]} {
    %c0 = arith.constant 0 : index
    %c0_0 = arith.constant 0 : index
    %0 = vector.load %arg2[%c0, %c0_0] : memref<1024x128xbf16, #tpu.memory_space<vmem>>, vector<1024x128xbf16>
    %c0_1 = arith.constant 0 : index
    %c0_2 = arith.constant 0 : index
    %1 = vector.load %arg3[%c0_1, %c0_2] : memref<128x128xbf16, #tpu.memory_space<vmem>>, vector<128x128xbf16>
    %cst = arith.constant dense<0.000000e+00> : vector<1024x128xf32>
    %2 = tpu.matmul %0, %1, %cst {dimension_numbers = #tpu.dot_dimension_numbers<[1], [0], [0], [1], [0, 0, 1, 1], [], []>} : vector<1024x128xbf16>, vector<128x128xbf16>, vector<1024x128xf32> -> vector<1024x128xf32>
    %3 = arith.truncf %2 : vector<1024x128xf32> to vector<1024x128xbf16>
    %c0_3 = arith.constant 0 : index
    %c0_4 = arith.constant 0 : index
    %4 = vector.load %arg4[%c0_3, %c0_4] : memref<1024x128xbf16, #tpu.memory_space<vmem>>, vector<1024x128xbf16>
    tpu.vector_store %arg4[%c0_3, %c0_4], %3 {strides = array<i32>} : memref<1024x128xbf16, #tpu.memory_space<vmem>>, vector<1024x128xbf16>,
    %5 = vector.shape_cast %2 : vector<1024x128xf32> to vector<128x8x128xf32>
    %c0_i32 = arith.constant 0 : i32
    %6 = arith.cmpi eq, %arg1, %c0_i32 : i32
    %7 = arith.extui %6 : i1 to i32
    %c0_i32_5 = arith.constant 0 : i32
    %8 = arith.cmpi ne, %7, %c0_i32_5 : i32
    scf.if %8 {
      %cst_16 = arith.constant 0.000000e+00 : f32
      %18 = vector.broadcast %cst_16 : f32 to vector<8x128xf32>
      %c0_17 = arith.constant 0 : index
      %c0_18 = arith.constant 0 : index
      %19 = vector.load %arg5[%c0_17, %c0_18] : memref<8x128xf32, #tpu.memory_space<vmem>>, vector<8x128xf32>
      tpu.vector_store %arg5[%c0_17, %c0_18], %18 {strides = array<i32>} : memref<8x128xf32, #tpu.memory_space<vmem>>, vector<8x128xf32>,
      %cst_19 = arith.constant 0.000000e+00 : f32
      %20 = vector.broadcast %cst_19 : f32 to vector<8x128xf32>
      %c0_20 = arith.constant 0 : index
      %c0_21 = arith.constant 0 : index
      %21 = vector.load %arg6[%c0_20, %c0_21] : memref<8x128xf32, #tpu.memory_space<vmem>>, vector<8x128xf32>
      tpu.vector_store %arg6[%c0_20, %c0_21], %20 {strides = array<i32>} : memref<8x128xf32, #tpu.memory_space<vmem>>, vector<8x128xf32>,
    } else {
    }
    %c0_6 = arith.constant 0 : index
    %c0_7 = arith.constant 0 : index
    %9 = vector.load %arg5[%c0_6, %c0_7] : memref<8x128xf32, #tpu.memory_space<vmem>>, vector<8x128xf32>
    %cst_8 = arith.constant dense<0.000000e+00> : vector<8x128xf32>
    %10 = vector.multi_reduction <add>, %5, %cst_8 [0] : vector<128x8x128xf32> to vector<8x128xf32>
    %11 = arith.addf %9, %10 : vector<8x128xf32>
    %c0_9 = arith.constant 0 : index
    %c0_10 = arith.constant 0 : index
    %12 = vector.load %arg5[%c0_9, %c0_10] : memref<8x128xf32, #tpu.memory_space<vmem>>, vector<8x128xf32>
    tpu.vector_store %arg5[%c0_9, %c0_10], %11 {strides = array<i32>} : memref<8x128xf32, #tpu.memory_space<vmem>>, vector<8x128xf32>,
    %c0_11 = arith.constant 0 : index
    %c0_12 = arith.constant 0 : index
    %13 = vector.load %arg6[%c0_11, %c0_12] : memref<8x128xf32, #tpu.memory_space<vmem>>, vector<8x128xf32>
    %14 = arith.mulf %5, %5 : vector<128x8x128xf32>
    %cst_13 = arith.constant dense<0.000000e+00> : vector<8x128xf32>
    %15 = vector.multi_reduction <add>, %14, %cst_13 [0] : vector<128x8x128xf32> to vector<8x128xf32>
    %16 = arith.addf %13, %15 : vector<8x128xf32>
    %c0_14 = arith.constant 0 : index
    %c0_15 = arith.constant 0 : index
    %17 = vector.load %arg6[%c0_14, %c0_15] : memref<8x128xf32, #tpu.memory_space<vmem>>, vector<8x128xf32>
    tpu.vector_store %arg6[%c0_14, %c0_15], %16 {strides = array<i32>} : memref<8x128xf32, #tpu.memory_space<vmem>>, vector<8x128xf32>,
    return
  }
  func.func @transform_0(%arg0: i32, %arg1: i32) -> (i32, i32) {
    %c1_i32 = arith.constant 1 : i32
    %0 = arith.muli %arg0, %c1_i32 : i32
    %1 = arith.addi %0, %arg1 : i32
    %c0_i32 = arith.constant 0 : i32
    %c0_i32_0 = arith.constant 0 : i32
    return %1, %c0_i32 : i32, i32
  }
  func.func @transform_1(%arg0: i32, %arg1: i32) -> (i32, i32) {
    %c0_i32 = arith.constant 0 : i32
    %c0_i32_0 = arith.constant 0 : i32
    %c0_i32_1 = arith.constant 0 : i32
    return %c0_i32, %c0_i32_0 : i32, i32
  }
  func.func @transform_2(%arg0: i32, %arg1: i32) -> (i32, i32) {
    %c1_i32 = arith.constant 1 : i32
    %0 = arith.muli %arg0, %c1_i32 : i32
    %1 = arith.addi %0, %arg1 : i32
    %c0_i32 = arith.constant 0 : i32
    %c0_i32_0 = arith.constant 0 : i32
    return %1, %c0_i32 : i32, i32
  }
  func.func @transform_3(%arg0: i32, %arg1: i32) -> (i32, i32) {
    %c0_i32 = arith.constant 0 : i32
    %c0_i32_0 = arith.constant 0 : i32
    return %arg0, %c0_i32 : i32, i32
  }
  func.func @transform_4(%arg0: i32, %arg1: i32) -> (i32, i32) {
    %c0_i32 = arith.constant 0 : i32
    %c0_i32_0 = arith.constant 0 : i32
    return %arg0, %c0_i32 : i32, i32
  }
}

</mosaic_0001>

<bundles_post_ra>
// kernel: tpu_custom_call.1
= control target key start
LH: loop header
LB: loop body
LE: loop exit
PB: predicated region body
PF: predicated region fallthrough
CT: control target
= control target key end

     0   :  { %10 = vsyncpa [#allocation3], 0  ;;  %s4812_s0 = inlined_call_operand.hbm [shape: bf16[2048,128], index: 0, kind: input, shape index: {}]   ;;  %s4813_s1 = inlined_call_operand.hbm [shape: bf16[128,128], index: 1, kind: input, shape index: {}]   ;;  %s4814_s2 = inlined_call_operand.hbm [shape: bf16[2048,128], index: 2, kind: output, shape index: {0}]   ;;  %s4815_s3 = inlined_call_operand.hbm [shape: f32[16,128], index: 3, kind: output, shape index: {1}]   ;;  %s4816_s4 = inlined_call_operand.hbm [shape: f32[16,128], index: 4, kind: output, shape index: {2}]  }
   0x1   :  { %12 = vsyncpa [#allocation3 + $0x1], 0 }
   0x2   :  { %13 = vsyncpa [#allocation6], 0 }
   0x3   :  { %14 = vsyncpa [#allocation4], 0 }
   0x4   :  { %16 = vsyncpa [#allocation4 + $0x1], 0 }
   0x5   :  { %17 = vsyncpa [#allocation9], 0 }
   0x6   :  { %19 = vsyncpa [#allocation9 + $0x1], 0  ;;  %s3999_s15 = smov 0   ;;  %s4001_s16 = smov 0  }
   0x7   :  { %s4003_s17 = smov 0   ;;  %s4005_s18 = smov 0  }
   0x8   :  { %s4007_s19 = smov 0   ;;  %s4009_s20 = smov 0  }
   0x9 LB: > { %s4030_s21 = sadd.s32 4294967295, %s3963_s20   ;;  %s4820_s22 = sadd.s32 4294967294, %s3963_s20   ;;  %s3963_s20 = sphi %s4009_s20, %s25_s20   ;;  %s3959_s19 = sphi %s4007_s19, %s4900_s19   ;;  %s3955_s18 = sphi %s4005_s18, %s4899_s18   ;;  %s3951_s17 = sphi %s4003_s17, %s4898_s17   ;;  %s3947_s16 = sphi %s4001_s16, %s4897_s16   ;;  %s3943_s15 = sphi %s3999_s15, %s4896_s15  }
   0xa   : > { %p59_p0 = scmp.ne.s32.totalorder %s3947_s16, %s3943_s15  ;;  %p4817_p1 = scmp.eq.s32.totalorder %s4030_s21, 0 }
   0xb   : > { %p112_p3 = scmp.eq.s32.totalorder %s4820_s22, 1  ;;  %p2633_p5 = scmp.ge.s32.totalorder %s3963_s20, 1 }
   0xc   : > { %p4041_p4 = por %p4817_p1, %p59_p0  ;;  %p171_p7 = scmp.lt.s32.totalorder %s3963_s20, 3 }
   0xd   : > { %p4046_p6 = por %p112_p3, %p59_p0  ;;  %s3965_s26 = smov [#allocation5]  }
   0xe   : > { %s4851_s23 = scalar_select %p4041_p4, 1, 0 }
   0xf   : > { %s4852_s24 = scalar_select %p4046_p6, 1, 0 }
  0x10   : > { %p4051_p8 = pnand %p2633_p5, %p171_p7  ;;  %s183_s27 = sshll.u32 %s3965_s26, 4  ;;  %s184_s27 = int_to_ptr.vmem [resolvable:$true] %s183_s27 }
  0x11   : > { %s37_s29 = sadd.s32 1, %s3959_s19  ;;  %s3759_s6 = scalar_lea.hbm %s4813_s1, 1024 }
  0x12   : > { %s4853_s25 = scalar_select %p4051_p8, 1, 0 }
  0x13   : > { %p3611_p9 = pneg %p4051_p8  ;;  %p3760_p12 = scmp.ne.s32.totalorder %s4813_s1, %s3759_s6 }
  0x14   : > { %p3766_p5 = scmp.lt.u32.totalorder %s3759_s6, %s4813_s1 }
  0x15   : > { %p4060_p11 = pnand %p3611_p9, %p4817_p1 }
  0x17   : > { %p3761_p13 = pneg %p4060_p11 }
  0x19   : > { %p3762_p0 = pnand %p3761_p13, %p3760_p12 }
  0x1b   : > { %p3763_p3 = pneg %p3762_p0 }
  0x1d   : > { %p3768_p7 = pnand %p3766_p5, %p3763_p3 }
  0x1f   : > { %3771 = shalt.err (!%p3768_p7)
}
  0x20   : > { %s3772_s11 = scalar_lea.vmem %s184_s27, 1024  ;;  %p3780_p2 = scmp.lt.s32.totalorder %s184_s27, %s184_s27 }
  0x21   : > { %p3773_p9 = scmp.ne.s32.totalorder %s184_s27, %s3772_s11  ;;  %p3781_p6 = scmp.lt.s32.totalorder %s3772_s11, %s3772_s11 }
  0x23   : > { %p3775_p10 = pnand %p3773_p9, %p3761_p13  ;;  %p3782_p4 = por %p3781_p6, %p3780_p2 }
  0x25   : > { %p3776_p1 = pneg %p3775_p10 }
  0x27   : > { %p3783_p8 = pnand %p3782_p4, %p3776_p1 }
  0x29   : > { %3786 = shalt.err (!%p3783_p8)
}
  0x2a   : > { %s3966_s12 = smov 64   ;;  %s3967_s13 = smov 4  }
  0x2b   : > { %3614 = dma.hbm_to_vmem [thread:$0]  (!%p4060_p11), %s4813_s1, 1024, %s184_s27, [#allocation6], %s3966_s12, %s3966_s12, %s3967_s13  }
  0x2c   : > { %p39_p1 = scmp.ge.s32.totalorder %s37_s29, 2  ;;  %s46_s30 = sadd.s32 1, %s3951_s17 }
  0x2d   : > { %p53_p2 = scmp.ne.s32.totalorder %s3951_s17, %s3947_s16  ;;  %p54_p4 = scmp.eq.s32.totalorder %s3963_s20, 0 }
  0x2e   : > { %s4902_s29 = smov (%p39_p1, %s37_s29), 0  ;;  %p4856_p8 = scmp.eq.s32.totalorder %s4030_s21, 1 }
  0x2f   : > { %p4090_p6 = por %p54_p4, %p53_p2  ;;  %s43_s6 = ssub.s32 %s3959_s19, %s4902_s29 }
  0x30   : > { %p4096_p10 = por %p4856_p8, %p53_p2  ;;  %p3630_p12 = scmp.lt.s32.totalorder %s3963_s20, 2 }
  0x31   : > { %p44_p11 = scmp.eq.s32.totalorder %s43_s6, 0  ;;  %s197_s27 = sand.u32 1, %s3951_s17  }
  0x32   : > { %s2636_s7 = sshll.u32 %s197_s27, 9  ;;  %s2854_s9 = sshll.u32 %s3959_s19, 13 }
  0x33   : > { %s4105_s8 = scalar_select %p44_p11, %s3951_s17, %s46_s30  }
  0x34   : > { %s4111_s14 = scalar_lea.hbm %s4812_s0, %s2854_s9  ;;  %s201_s26 = scalar_lea.vmem [#allocation2], %s2636_s7 }
  0x35   : > { %s209_s22 = sshll.u32 %s201_s26, 4  ;;  %p4117_p13 = pnand %p3630_p12, %p4090_p6  ;;  %s4113_s22 = int_to_ptr.vmem [resolvable:$true] %s209_s22 }
  0x36   : > { %s4121_s30 = scalar_lea.sflag [#allocation3], %s197_s27  ;;  %s3787_s10 = scalar_lea.hbm %s4111_s14, 8192 }
  0x37   : > { %p3788_p0 = scmp.ne.s32.totalorder %s4111_s14, %s3787_s10  ;;  %p3789_p3 = pneg %p4117_p13 }
  0x38   : > { %s3792_s5 = scalar_lea.hbm %s4812_s0, 16384  ;;  %p3793_p9 = scmp.lt.u32.totalorder %s4111_s14, %s4812_s0 }
  0x39   : > { %p3790_p5 = pnand %p3789_p3, %p3788_p0  ;;  %p3794_p1 = scmp.lt.u32.totalorder %s3792_s5, %s3787_s10 }
  0x3a   : > { %p3796_p4 = scmp.lt.u32.totalorder %s3787_s10, %s4111_s14 }
  0x3b   : > { %p3791_p7 = pneg %p3790_p5  ;;  %p3795_p2 = por %p3794_p1, %p3793_p9 }
  0x3d   : > { %p3797_p6 = por %p3796_p4, %p3795_p2 }
  0x3f   : > { %p3798_p8 = pnand %p3797_p6, %p3791_p7 }
  0x41   : > { %3801 = shalt.err (!%p3798_p8)
}
  0x42   : > { %s3802_s27 = scalar_lea.vmem %s4113_s22, 8192  ;;  %s3968_s7 = smov [#allocation2]  }
  0x43   : > { %p3803_p12 = scmp.ne.s32.totalorder %s4113_s22, %s3802_s27  ;;  %s3807_s9 = sshll.u32 %s3968_s7, 4  ;;  %s3808_s9 = int_to_ptr.vmem [resolvable:$false] %s3807_s9 }
  0x44   : > { %s3809_s11 = scalar_lea.vmem %s3808_s9, 16384  ;;  %p3810_p5 = scmp.lt.s32.totalorder %s4113_s22, %s3808_s9 }
  0x45   : > { %p3805_p11 = pnand %p3803_p12, %p3789_p3  ;;  %p3811_p9 = scmp.lt.s32.totalorder %s3809_s11, %s3802_s27 }
  0x47   : > { %p3806_p0 = pneg %p3805_p11  ;;  %p3812_p1 = por %p3811_p9, %p3810_p5 }
  0x49   : > { %p3813_p2 = pnand %p3812_p1, %p3806_p0 }
  0x4b   : > { %3816 = shalt.err (!%p3813_p2)
}
  0x4c   : > { %3618 = dma.hbm_to_vmem [thread:$0]  (!%p4117_p13), %s4111_s14, 8192, %s4113_s22, %s4121_s30, %s3966_s12, %s3966_s12, %s3967_s13  }
  0x4d   : > { %p4859_p3 = scmp.ne.s32.totalorder %s4853_s25, 0 }
  0x4f   : > { %221 = sbr.rel (%p4859_p3) target bundleno = 642 (0x282), region = 28 }
  0x56   : > { %s4155_s10 = sand.u32 1, %s3947_s16   ;;  %p4860_p7 = scmp.ne.s32.totalorder %s4851_s23, 0 }
  0x57   : > { %s2640_s5 = sshll.u32 %s4155_s10, 9  ;;  %s224_s26 = scalar_lea.sflag [#allocation3], %s4155_s10 }
  0x58   : > { %s4161_s6 = scalar_lea.vmem [#allocation2], %s2640_s5 }
  0x59   : > { %3926 = dma.done.wait (%p4860_p7), %s224_s26, 8192  }
  0x5a   : > { %3928 = vsyncadd (%p4860_p7), %s224_s26, 4294959104  ;;  %p4861_p13 = scmp.eq.s32.totalorder %s4030_s21, 0 }
  0x5c   : > { %3930 = dma.done.wait (%p4861_p13), [#allocation6], 1024   ;;  %p4862_p4 = pmov %p4861_p13 }
  0x5d   : > { %v3687_v0 = vld [vmem:[#allocation5] sm:$0xff]   ;;  %v3688_v1 = vld [vmem:[#allocation5 + $0x8] sm:$0xff]   ;;  %v3689_v2 = vld [vmem:[#allocation5 + $0x10] sm:$0xff]   ;;  %s4237_s22 = scalar_lea.vmem [#allocation7], %s2640_s5  ;;  %s2983_s23 = sshll.u32 %s3955_s18, 13 }
  0x5e   : > { %3932 = vsyncadd (%p4862_p4), [#allocation6], 4294966272  ;;  %3439 = vmatprep.subr.bf16.mxu0 %v3687_v0  ;;  %3583 = vmatprep.subr.bf16.mxu1 %v3687_v0  ;;  %v3690_v3 = vld [vmem:[#allocation5 + $0x18] sm:$0xff]   ;;  %v3695_v4 = vld [vmem:[%s4161_s6] sm:$0xff]   ;;  %s2451_s25 = sshll.u32 %s4237_s22, 4  ;;  %s4514_s14 = scalar_lea.hbm %s4814_s2, %s2983_s23  ;;  %s4516_s25 = int_to_ptr.vmem [resolvable:$true] %s2451_s25 }
  0x5f   : > { %3440 = vmatpush3.bf16.msra.mxu0 %v3687_v0  ;;  %3591 = vmatpush3.bf16.msra.mxu1 %v3687_v0  ;;  %v3691_v5 = vld [vmem:[#allocation5 + $0x20] sm:$0xff]   ;;  %v3692_v6 = vld [vmem:[#allocation5 + $0x28] sm:$0xff]   ;;  %v3693_v7 = vld [vmem:[#allocation5 + $0x30] sm:$0xff]   ;;  %s2427_s30 = scalar_lea.sflag [#allocation4], %s4155_s10  ;;  %s3817_s27 = scalar_lea.vmem %s4516_s25, 8192 }
  0x60   : > { %3441 = vmatprep.subr.bf16.mxu0 %v3688_v1  ;;  %3584 = vmatprep.subr.bf16.mxu1 %v3688_v1  ;;  %v3694_v8 = vld [vmem:[#allocation5 + $0x38] sm:$0xff]   ;;  %v3696_v9 = vld [vmem:[%s4161_s6 + $0x8] sm:$0xff]   ;;  %v3697_v10 = vld [vmem:[%s4161_s6 + $0x10] sm:$0xff]   ;;  %p3818_p6 = scmp.ne.s32.totalorder %s4516_s25, %s3817_s27  ;;  %s3969_s7 = smov [#allocation7]  }
  0x61   : > { %3455 = vmatprep.mubr.bf16.mxu0 %v3695_v4  ;;  %v3698_v11 = vld [vmem:[%s4161_s6 + $0x18] sm:$0xff]   ;;  %v3699_v12 = vld [vmem:[%s4161_s6 + $0x20] sm:$0xff]   ;;  %v3728_v14 = vld [vmem:[%s4161_s6 + $0x108] sm:$0xff]   ;;  %s3821_s9 = sshll.u32 %s3969_s7, 4  ;;  %s3822_s9 = int_to_ptr.vmem [resolvable:$false] %s3821_s9 }
  0x62   : > { %v3727_v13 = vld [vmem:[%s4161_s6 + $0x100] sm:$0xff]   ;;  %v3729_v15 = vld [vmem:[%s4161_s6 + $0x110] sm:$0xff]   ;;  %v3700_v16 = vld [vmem:[%s4161_s6 + $0x28] sm:$0xff]   ;;  %p3819_p8 = pnand %p3818_p6, %p4096_p10  ;;  %s3823_s11 = scalar_lea.vmem %s3822_s9, 16384 }
  0x63   : > { %3442 = vmatpush3.bf16.msra.mxu0 %v3688_v1  ;;  %3592 = vmatpush3.bf16.msra.mxu1 %v3688_v1  ;;  %v3701_v17 = vld [vmem:[%s4161_s6 + $0x30] sm:$0xff]   ;;  %v3730_v18 = vld [vmem:[%s4161_s6 + $0x118] sm:$0xff]   ;;  %v3731_v19 = vld [vmem:[%s4161_s6 + $0x120] sm:$0xff]   ;;  %p3824_p11 = scmp.lt.s32.totalorder %s4516_s25, %s3822_s9  ;;  %p3825_p0 = scmp.lt.s32.totalorder %s3823_s11, %s3817_s27 }
  0x64   : > { %3443 = vmatprep.subr.bf16.mxu0 %v3689_v2  ;;  %3585 = vmatprep.subr.bf16.mxu1 %v3689_v2  ;;  %v3702_v20 = vld [vmem:[%s4161_s6 + $0x38] sm:$0xff]   ;;  %v3703_v21 = vld [vmem:[%s4161_s6 + $0x40] sm:$0xff]   ;;  %v3732_v22 = vld [vmem:[%s4161_s6 + $0x128] sm:$0xff]   ;;  %p3820_p12 = pneg %p3819_p8 }
  0x65   : > { %3519 = vmatprep.mubr.bf16.mxu1 %v3727_v13  ;;  %v3733_v23 = vld [vmem:[%s4161_s6 + $0x130] sm:$0xff]   ;;  %v3704_v24 = vld [vmem:[%s4161_s6 + $0x48] sm:$0xff]   ;;  %v3734_v26 = vld [vmem:[%s4161_s6 + $0x138] sm:$0xff]   ;;  %p3826_p5 = por %p3825_p0, %p3824_p11 }
  0x66   : > { %v3705_v25 = vld [vmem:[%s4161_s6 + $0x50] sm:$0xff]   ;;  %v3735_v27 = vld [vmem:[%s4161_s6 + $0x140] sm:$0xff]   ;;  %v3706_v28 = vld [vmem:[%s4161_s6 + $0x58] sm:$0xff]  }
  0x67   : > { %3444 = vmatpush3.bf16.msra.mxu0 %v3689_v2  ;;  %3593 = vmatpush3.bf16.msra.mxu1 %v3689_v2  ;;  %v3707_v29 = vld [vmem:[%s4161_s6 + $0x60] sm:$0xff]   ;;  %v3736_v30 = vld [vmem:[%s4161_s6 + $0x148] sm:$0xff]   ;;  %v3737_v31 = vld [vmem:[%s4161_s6 + $0x150] sm:$0xff]   ;;  %p3827_p9 = pnand %p3826_p5, %p3820_p12 }
  0x68   : > { %3445 = vmatprep.subr.bf16.mxu0 %v3690_v3  ;;  %3586 = vmatprep.subr.bf16.mxu1 %v3690_v3  ;;  %v3708_v32 = vld [vmem:[%s4161_s6 + $0x68] sm:$0xff]   ;;  %v3709_v33 = vld [vmem:[%s4161_s6 + $0x70] sm:$0xff]   ;;  %v3738_v34 = vld [vmem:[%s4161_s6 + $0x158] sm:$0xff]  }
  0x69   : > { %v3739_v35 = vld [vmem:[%s4161_s6 + $0x160] sm:$0xff]   ;;  %v3710_v36 = vld [vmem:[%s4161_s6 + $0x78] sm:$0xff]   ;;  %v3740_v38 = vld [vmem:[%s4161_s6 + $0x168] sm:$0xff]  }
  0x6a   : > { %v3711_v37 = vld [vmem:[%s4161_s6 + $0x80] sm:$0xff]   ;;  %v3741_v39 = vld [vmem:[%s4161_s6 + $0x170] sm:$0xff]   ;;  %v3712_v40 = vld [vmem:[%s4161_s6 + $0x88] sm:$0xff]  }
  0x6b   : > { %3446 = vmatpush3.bf16.msra.mxu0 %v3690_v3  ;;  %3594 = vmatpush3.bf16.msra.mxu1 %v3690_v3  ;;  %v3713_v41 = vld [vmem:[%s4161_s6 + $0x90] sm:$0xff]   ;;  %v3742_v42 = vld [vmem:[%s4161_s6 + $0x178] sm:$0xff]   ;;  %v3743_v43 = vld [vmem:[%s4161_s6 + $0x180] sm:$0xff]  }
  0x6c   : > { %3447 = vmatprep.subr.bf16.mxu0 %v3691_v5  ;;  %3587 = vmatprep.subr.bf16.mxu1 %v3691_v5  ;;  %v3714_v44 = vld [vmem:[%s4161_s6 + $0x98] sm:$0xff]   ;;  %v3715_v45 = vld [vmem:[%s4161_s6 + $0xa0] sm:$0xff]   ;;  %v3744_v46 = vld [vmem:[%s4161_s6 + $0x188] sm:$0xff]  }
  0x6d   : > { %v3745_v47 = vld [vmem:[%s4161_s6 + $0x190] sm:$0xff]   ;;  %v3716_v48 = vld [vmem:[%s4161_s6 + $0xa8] sm:$0xff]   ;;  %v3746_v50 = vld [vmem:[%s4161_s6 + $0x198] sm:$0xff]  }
  0x6e   : > { %v3717_v49 = vld [vmem:[%s4161_s6 + $0xb0] sm:$0xff]   ;;  %v3747_v51 = vld [vmem:[%s4161_s6 + $0x1a0] sm:$0xff]   ;;  %v3718_v52 = vld [vmem:[%s4161_s6 + $0xb8] sm:$0xff]  }
  0x6f   : > { %3448 = vmatpush3.bf16.msra.mxu0 %v3691_v5  ;;  %3595 = vmatpush3.bf16.msra.mxu1 %v3691_v5  ;;  %v3719_v53 = vld [vmem:[%s4161_s6 + $0xc0] sm:$0xff]   ;;  %v3748_v54 = vld [vmem:[%s4161_s6 + $0x1a8] sm:$0xff]   ;;  %v3749_v55 = vld [vmem:[%s4161_s6 + $0x1b0] sm:$0xff]  }
  0x70   : > { %3449 = vmatprep.subr.bf16.mxu0 %v3692_v6  ;;  %3588 = vmatprep.subr.bf16.mxu1 %v3692_v6  ;;  %v3720_v56 = vld [vmem:[%s4161_s6 + $0xc8] sm:$0xff]   ;;  %v3721_v57 = vld [vmem:[%s4161_s6 + $0xd0] sm:$0xff]   ;;  %v3750_v58 = vld [vmem:[%s4161_s6 + $0x1b8] sm:$0xff]  }
  0x71   : > { %v3751_v59 = vld [vmem:[%s4161_s6 + $0x1c0] sm:$0xff]   ;;  %v3722_v60 = vld [vmem:[%s4161_s6 + $0xd8] sm:$0xff]   ;;  %v3752_v62 = vld [vmem:[%s4161_s6 + $0x1c8] sm:$0xff]  }
  0x72   : > { %v3723_v61 = vld [vmem:[%s4161_s6 + $0xe0] sm:$0xff]   ;;  %v3753_v63 = vld [vmem:[%s4161_s6 + $0x1d0] sm:$0xff]   ;;  %v3724_v0 = vld [vmem:[%s4161_s6 + $0xe8] sm:$0xff]  }
  0x73   : > { %3450 = vmatpush3.bf16.msra.mxu0 %v3692_v6  ;;  %3596 = vmatpush3.bf16.msra.mxu1 %v3692_v6  ;;  %v3725_v1 = vld [vmem:[%s4161_s6 + $0xf0] sm:$0xff]   ;;  %v3754_v2 = vld [vmem:[%s4161_s6 + $0x1d8] sm:$0xff]   ;;  %v3755_v3 = vld [vmem:[%s4161_s6 + $0x1e0] sm:$0xff]  }
  0x74   : > { %3451 = vmatprep.subr.bf16.mxu0 %v3693_v7  ;;  %3589 = vmatprep.subr.bf16.mxu1 %v3693_v7  ;;  %v3726_v4 = vld [vmem:[%s4161_s6 + $0xf8] sm:$0xff]   ;;  %v3756_v5 = vld [vmem:[%s4161_s6 + $0x1e8] sm:$0xff]   ;;  %v3757_v6 = vld [vmem:[%s4161_s6 + $0x1f0] sm:$0xff]  }
  0x77   : > { %3452 = vmatpush3.bf16.msra.mxu0 %v3693_v7  ;;  %3597 = vmatpush3.bf16.msra.mxu1 %v3693_v7  ;;  %v3758_v7 = vld [vmem:[%s4161_s6 + $0x1f8] sm:$0xff]  }
  0x78   : > { %3453 = vmatprep.subr.bf16.mxu0 %v3694_v8  ;;  %3590 = vmatprep.subr.bf16.mxu1 %v3694_v8 }
  0x7b   : > { %3454 = vmatpush3.bf16.msra.mxu0 %v3694_v8  ;;  %3598 = vmatpush3.bf16.msra.mxu1 %v3694_v8 }
  0x7e   : > { %3456 = vmatmul.mubr.bf16.vlgmr.msra.gmra.mrb[0].mxu0 %v3696_v9  ;;  %3520 = vmatmul.mubr.bf16.vlgmr.msra.gmra.mrb[0].mxu1 %v3728_v14 }
  0x7f   : > { %3459 = vmatprep.mubr.bf16.mxu0 %v3697_v10  ;;  %3523 = vmatprep.mubr.bf16.mxu1 %v3729_v15 }
  0x86   : > { %3460 = vmatmul.mubr.bf16.gmra.mrb[4].mxu0 %v3698_v11  ;;  %3524 = vmatmul.mubr.bf16.gmra.mrb[4].mxu1 %v3730_v18 }
  0x87   : > { %3463 = vmatprep.mubr.bf16.mxu0 %v3699_v12  ;;  %3527 = vmatprep.mubr.bf16.mxu1 %v3731_v19 }
  0x8e   : > { %3464 = vmatmul.mubr.bf16.gmra.mrb[8].mxu0 %v3700_v16  ;;  %3528 = vmatmul.mubr.bf16.gmra.mrb[8].mxu1 %v3732_v22 }
  0x8f   : > { %3467 = vmatprep.mubr.bf16.mxu0 %v3701_v17  ;;  %3531 = vmatprep.mubr.bf16.mxu1 %v3733_v23 }
  0x96   : > { %3468 = vmatmul.mubr.bf16.gmra.mrb[12].mxu0 %v3702_v20  ;;  %3532 = vmatmul.mubr.bf16.gmra.mrb[12].mxu1 %v3734_v26 }
  0x97   : > { %3471 = vmatprep.mubr.bf16.mxu0 %v3703_v21  ;;  %3535 = vmatprep.mubr.bf16.mxu1 %v3735_v27 }
  0x9e   : > { %3472 = vmatmul.mubr.bf16.gmra.mrb[16].mxu0 %v3704_v24  ;;  %3536 = vmatmul.mubr.bf16.gmra.mrb[16].mxu1 %v3736_v30 }
  0x9f   : > { %3475 = vmatprep.mubr.bf16.mxu0 %v3705_v25  ;;  %3539 = vmatprep.mubr.bf16.mxu1 %v3737_v31 }
  0xa6   : > { %3476 = vmatmul.mubr.bf16.gmra.mrb[20].mxu0 %v3706_v28  ;;  %3540 = vmatmul.mubr.bf16.gmra.mrb[20].mxu1 %v3738_v34 }
  0xa7   : > { %3479 = vmatprep.mubr.bf16.mxu0 %v3707_v29  ;;  %3543 = vmatprep.mubr.bf16.mxu1 %v3739_v35 }
  0xae   : > { %3480 = vmatmul.mubr.bf16.gmra.mrb[24].mxu0 %v3708_v32  ;;  %3544 = vmatmul.mubr.bf16.gmra.mrb[24].mxu1 %v3740_v38 }
  0xaf   : > { %3483 = vmatprep.mubr.bf16.mxu0 %v3709_v33  ;;  %3547 = vmatprep.mubr.bf16.mxu1 %v3741_v39 }
  0xb6   : > { %3484 = vmatmul.mubr.bf16.gmra.mrb[28].mxu0 %v3710_v36  ;;  %3548 = vmatmul.mubr.bf16.gmra.mrb[28].mxu1 %v3742_v42 }
  0xb7   : > { %3487 = vmatprep.mubr.bf16.mxu0 %v3711_v37  ;;  %3551 = vmatprep.mubr.bf16.mxu1 %v3743_v43 }
  0xbe   : > { %3488 = vmatmul.mubr.bf16.gmra.mrb[32].mxu0 %v3712_v40  ;;  %3552 = vmatmul.mubr.bf16.gmra.mrb[32].mxu1 %v3744_v46 }
  0xbf   : > { %3491 = vmatprep.mubr.bf16.mxu0 %v3713_v41  ;;  %3555 = vmatprep.mubr.bf16.mxu1 %v3745_v47 }
  0xc6   : > { %3492 = vmatmul.mubr.bf16.gmra.mrb[36].mxu0 %v3714_v44  ;;  %3556 = vmatmul.mubr.bf16.gmra.mrb[36].mxu1 %v3746_v50 }
  0xc7   : > { %3495 = vmatprep.mubr.bf16.mxu0 %v3715_v45  ;;  %3559 = vmatprep.mubr.bf16.mxu1 %v3747_v51 }
  0xce   : > { %3496 = vmatmul.mubr.bf16.gmra.mrb[40].mxu0 %v3716_v48  ;;  %3560 = vmatmul.mubr.bf16.gmra.mrb[40].mxu1 %v3748_v54 }
  0xcf   : > { %3499 = vmatprep.mubr.bf16.mxu0 %v3717_v49  ;;  %3563 = vmatprep.mubr.bf16.mxu1 %v3749_v55 }
  0xd6   : > { %3500 = vmatmul.mubr.bf16.gmra.mrb[44].mxu0 %v3718_v52  ;;  %3564 = vmatmul.mubr.bf16.gmra.mrb[44].mxu1 %v3750_v58 }
  0xd7   : > { %3503 = vmatprep.mubr.bf16.mxu0 %v3719_v53  ;;  %3567 = vmatprep.mubr.bf16.mxu1 %v3751_v59 }
  0xde   : > { %3504 = vmatmul.mubr.bf16.gmra.mrb[48].mxu0 %v3720_v56  ;;  %3568 = vmatmul.mubr.bf16.gmra.mrb[48].mxu1 %v3752_v62 }
  0xdf   : > { %3507 = vmatprep.mubr.bf16.mxu0 %v3721_v57  ;;  %3571 = vmatprep.mubr.bf16.mxu1 %v3753_v63 }
  0xe6   : > { %3508 = vmatmul.mubr.bf16.gmra.mrb[52].mxu0 %v3722_v60  ;;  %3572 = vmatmul.mubr.bf16.gmra.mrb[52].mxu1 %v3754_v2 }
  0xe7   : > { %3511 = vmatprep.mubr.bf16.mxu0 %v3723_v61  ;;  %3575 = vmatprep.mubr.bf16.mxu1 %v3755_v3 }
  0xee   : > { %3512 = vmatmul.mubr.bf16.gmra.mrb[56].mxu0 %v3724_v0  ;;  %3576 = vmatmul.mubr.bf16.gmra.mrb[56].mxu1 %v3756_v5 }
  0xef   : > { %3515 = vmatprep.mubr.bf16.mxu0 %v3725_v1  ;;  %3579 = vmatprep.mubr.bf16.mxu1 %v3757_v6 }
  0xf6   : > { %3516 = vmatmul.mubr.bf16.gmra.mrb[60].mxu0 %v3726_v4  ;;  %3580 = vmatmul.mubr.bf16.gmra.mrb[60].mxu1 %v3758_v7 }
 0x151   : > { %v3457_v8 = vpop.f32.mrb[0].mxu0  ;;  %v4241_v25 = vpop.f32.mrb[0].mxu1 }
 0x152   : > { %v881_v9 = vpop.f32.mrb[1].mxu0  ;;  %v2171_v17 = vmul.f32 %v3457_v8, %v3457_v8  ;;  %v4243_v30 = vpop.f32.mrb[1].mxu1 }
 0x153   : > { %v3458_v10 = vpop.f32.mrb[2].mxu0  ;;  %v2169_v13 = vmul.f32 %v881_v9, %v881_v9  ;;  %v4245_v33 = vpop.f32.mrb[2].mxu1 }
 0x154   : > { %v2992_v11 = vpack.c.bf16 %v3458_v10, %v3457_v8  ;;  %v884_v12 = vpop.f32.mrb[3].mxu0  ;;  %v2172_v20 = vmul.f32 %v3458_v10, %v3458_v10  ;;  %v4247_v38 = vpop.f32.mrb[3].mxu1  ;;  %v3152_v39 = vpack.c.bf16 %v4245_v33, %v4241_v25 }
 0x155   : > { %v2987_v14 = vpack.c.bf16 %v884_v12, %v881_v9  ;;  %v2039_v15 = vadd.f32 %v884_v12, %v881_v9  ;;  %v2170_v16 = vmul.f32 %v884_v12, %v884_v12  ;;  %v3147_v40 = vpack.c.bf16 %v4247_v38, %v4243_v30 }
 0x156   : > { %3304 = vst [vmem:[%s4237_s22 + $0x8] sm:$0xff] %v2992_v11   ;;  %3336 = vst [vmem:[%s4237_s22 + $0x108] sm:$0xff] %v3152_v39  }
 0x157   : > { %2988 = vst [vmem:[%s4237_s22] sm:$0xff] %v2987_v14   ;;  %v2040_v18 = vadd.f32 %v3457_v8, %v2039_v15  ;;  %v2297_v19 = vadd.f32 %v2170_v16, %v2169_v13  ;;  %3335 = vst [vmem:[%s4237_s22 + $0x100] sm:$0xff] %v3147_v40  }
 0x159   : > { %v2041_v21 = vadd.f32 %v3458_v10, %v2040_v18  ;;  %v2298_v22 = vadd.f32 %v2297_v19, %v2171_v17  ;;  %v3461_v23 = vpop.f32.mrb[4].mxu0  ;;  %v4257_v49 = vpop.f32.mrb[4].mxu1 }
 0x15a   : > { %v897_v24 = vpop.f32.mrb[5].mxu0  ;;  %v2175_v41 = vmul.f32 %v3461_v23, %v3461_v23  ;;  %v4259_v54 = vpop.f32.mrb[5].mxu1 }
 0x15b   : > { %v2299_v26 = vadd.f32 %v2298_v22, %v2172_v20  ;;  %v2042_v27 = vadd.f32 %v2041_v21, %v897_v24  ;;  %v2173_v28 = vmul.f32 %v897_v24, %v897_v24  ;;  %v3462_v29 = vpop.f32.mrb[6].mxu0  ;;  %v4261_v57 = vpop.f32.mrb[6].mxu1 }
 0x15c   : > { %v3002_v31 = vpack.c.bf16 %v3462_v29, %v3461_v23  ;;  %v900_v32 = vpop.f32.mrb[7].mxu0  ;;  %v2176_v44 = vmul.f32 %v3462_v29, %v3462_v29  ;;  %v4263_v62 = vpop.f32.mrb[7].mxu1  ;;  %v3162_v63 = vpack.c.bf16 %v4261_v57, %v4257_v49 }
 0x15d   : > { %v2300_v34 = vadd.f32 %v2299_v26, %v2173_v28  ;;  %v2997_v35 = vpack.c.bf16 %v900_v32, %v897_v24  ;;  %v2043_v36 = vadd.f32 %v2042_v27, %v900_v32  ;;  %v2174_v37 = vmul.f32 %v900_v32, %v900_v32 }
 0x15e   : > { %3306 = vst [vmem:[%s4237_s22 + $0x18] sm:$0xff] %v3002_v31   ;;  %v3157_v0 = vpack.c.bf16 %v4263_v62, %v4259_v54  ;;  %3338 = vst [vmem:[%s4237_s22 + $0x118] sm:$0xff] %v3162_v63  }
 0x15f   : > { %3305 = vst [vmem:[%s4237_s22 + $0x10] sm:$0xff] %v2997_v35   ;;  %v2044_v42 = vadd.f32 %v3461_v23, %v2043_v36  ;;  %v2301_v43 = vadd.f32 %v2300_v34, %v2174_v37 }
 0x160   : > { %3337 = vst [vmem:[%s4237_s22 + $0x110] sm:$0xff] %v3157_v0  }
 0x161   : > { %v2302_v45 = vadd.f32 %v2301_v43, %v2175_v41  ;;  %v3465_v46 = vpop.f32.mrb[8].mxu0  ;;  %v2045_v47 = vadd.f32 %v3462_v29, %v2044_v42  ;;  %v4273_v9 = vpop.f32.mrb[8].mxu1 }
 0x162   : > { %v913_v48 = vpop.f32.mrb[9].mxu0  ;;  %v2179_v1 = vmul.f32 %v3465_v46, %v3465_v46  ;;  %v4275_v14 = vpop.f32.mrb[9].mxu1 }
 0x163   : > { %v2046_v50 = vadd.f32 %v2045_v47, %v913_v48  ;;  %v2177_v51 = vmul.f32 %v913_v48, %v913_v48  ;;  %v2303_v52 = vadd.f32 %v2302_v45, %v2176_v44  ;;  %v3466_v53 = vpop.f32.mrb[10].mxu0  ;;  %v4277_v17 = vpop.f32.mrb[10].mxu1 }
 0x164   : > { %v3012_v55 = vpack.c.bf16 %v3466_v53, %v3465_v46  ;;  %v916_v56 = vpop.f32.mrb[11].mxu0  ;;  %v2180_v4 = vmul.f32 %v3466_v53, %v3466_v53  ;;  %v4279_v22 = vpop.f32.mrb[11].mxu1  ;;  %v3172_v23 = vpack.c.bf16 %v4277_v17, %v4273_v9 }
 0x165   : > { %v2304_v58 = vadd.f32 %v2303_v52, %v2177_v51  ;;  %v3007_v59 = vpack.c.bf16 %v916_v56, %v913_v48  ;;  %v2047_v60 = vadd.f32 %v2046_v50, %v916_v56  ;;  %v2178_v61 = vmul.f32 %v916_v56, %v916_v56 }
 0x166   : > { %3308 = vst [vmem:[%s4237_s22 + $0x28] sm:$0xff] %v3012_v55   ;;  %v3167_v24 = vpack.c.bf16 %v4279_v22, %v4275_v14  ;;  %3340 = vst [vmem:[%s4237_s22 + $0x128] sm:$0xff] %v3172_v23  }
 0x167   : > { %3307 = vst [vmem:[%s4237_s22 + $0x20] sm:$0xff] %v3007_v59   ;;  %v2048_v2 = vadd.f32 %v3465_v46, %v2047_v60  ;;  %v2305_v3 = vadd.f32 %v2304_v58, %v2178_v61 }
 0x168   : > { %3339 = vst [vmem:[%s4237_s22 + $0x120] sm:$0xff] %v3167_v24  }
 0x169   : > { %v2306_v5 = vadd.f32 %v2305_v3, %v2179_v1  ;;  %v3469_v6 = vpop.f32.mrb[12].mxu0  ;;  %v2049_v7 = vadd.f32 %v3466_v53, %v2048_v2  ;;  %v4289_v36 = vpop.f32.mrb[12].mxu1 }
 0x16a   : > { %v929_v8 = vpop.f32.mrb[13].mxu0  ;;  %v2183_v26 = vmul.f32 %v3469_v6, %v3469_v6  ;;  %v4291_v42 = vpop.f32.mrb[13].mxu1 }
 0x16b   : > { %v2050_v10 = vadd.f32 %v2049_v7, %v929_v8  ;;  %v2181_v11 = vmul.f32 %v929_v8, %v929_v8  ;;  %v2307_v12 = vadd.f32 %v2306_v5, %v2180_v4  ;;  %v3470_v13 = vpop.f32.mrb[14].mxu0  ;;  %v4293_v45 = vpop.f32.mrb[14].mxu1 }
 0x16c   : > { %v3022_v15 = vpack.c.bf16 %v3470_v13, %v3469_v6  ;;  %v932_v16 = vpop.f32.mrb[15].mxu0  ;;  %v2184_v29 = vmul.f32 %v3470_v13, %v3470_v13  ;;  %v4295_v51 = vpop.f32.mrb[15].mxu1  ;;  %v3182_v52 = vpack.c.bf16 %v4293_v45, %v4289_v36 }
 0x16d   : > { %v2308_v18 = vadd.f32 %v2307_v12, %v2181_v11  ;;  %v3017_v19 = vpack.c.bf16 %v932_v16, %v929_v8  ;;  %v2051_v20 = vadd.f32 %v2050_v10, %v932_v16  ;;  %v2182_v21 = vmul.f32 %v932_v16, %v932_v16 }
 0x16e   : > { %3310 = vst [vmem:[%s4237_s22 + $0x38] sm:$0xff] %v3022_v15   ;;  %v3177_v53 = vpack.c.bf16 %v4295_v51, %v4291_v42  ;;  %3342 = vst [vmem:[%s4237_s22 + $0x138] sm:$0xff] %v3182_v52  }
 0x16f   : > { %3309 = vst [vmem:[%s4237_s22 + $0x30] sm:$0xff] %v3017_v19   ;;  %v2052_v27 = vadd.f32 %v3469_v6, %v2051_v20  ;;  %v2309_v28 = vadd.f32 %v2308_v18, %v2182_v21 }
 0x170   : > { %3341 = vst [vmem:[%s4237_s22 + $0x130] sm:$0xff] %v3177_v53  }
 0x171   : > { %v2310_v31 = vadd.f32 %v2309_v28, %v2183_v26  ;;  %v3473_v32 = vpop.f32.mrb[16].mxu0  ;;  %v2053_v34 = vadd.f32 %v3470_v13, %v2052_v27  ;;  %v4305_v1 = vpop.f32.mrb[16].mxu1 }
 0x172   : > { %v945_v35 = vpop.f32.mrb[17].mxu0  ;;  %v2187_v55 = vmul.f32 %v3473_v32, %v3473_v32  ;;  %v4307_v6 = vpop.f32.mrb[17].mxu1 }
 0x173   : > { %v2054_v37 = vadd.f32 %v2053_v34, %v945_v35  ;;  %v2185_v39 = vmul.f32 %v945_v35, %v945_v35  ;;  %v2311_v40 = vadd.f32 %v2310_v31, %v2184_v29  ;;  %v3474_v41 = vpop.f32.mrb[18].mxu0  ;;  %v4309_v10 = vpop.f32.mrb[18].mxu1 }
 0x174   : > { %v3032_v43 = vpack.c.bf16 %v3474_v41, %v3473_v32  ;;  %v948_v44 = vpop.f32.mrb[19].mxu0  ;;  %v2188_v59 = vmul.f32 %v3474_v41, %v3474_v41  ;;  %v4311_v16 = vpop.f32.mrb[19].mxu1  ;;  %v3192_v18 = vpack.c.bf16 %v4309_v10, %v4305_v1 }
 0x175   : > { %v2312_v46 = vadd.f32 %v2311_v40, %v2185_v39  ;;  %v3027_v47 = vpack.c.bf16 %v948_v44, %v945_v35  ;;  %v2055_v48 = vadd.f32 %v2054_v37, %v948_v44  ;;  %v2186_v50 = vmul.f32 %v948_v44, %v948_v44 }
 0x176   : > { %3312 = vst [vmem:[%s4237_s22 + $0x48] sm:$0xff] %v3032_v43   ;;  %v3187_v19 = vpack.c.bf16 %v4311_v16, %v4307_v6  ;;  %3344 = vst [vmem:[%s4237_s22 + $0x148] sm:$0xff] %v3192_v18  }
 0x177   : > { %3311 = vst [vmem:[%s4237_s22 + $0x40] sm:$0xff] %v3027_v47   ;;  %v2056_v56 = vadd.f32 %v3473_v32, %v2055_v48  ;;  %v2313_v58 = vadd.f32 %v2312_v46, %v2186_v50 }
 0x178   : > { %3343 = vst [vmem:[%s4237_s22 + $0x140] sm:$0xff] %v3187_v19  }
 0x179   : > { %v2314_v60 = vadd.f32 %v2313_v58, %v2187_v55  ;;  %v3477_v61 = vpop.f32.mrb[20].mxu0  ;;  %v2057_v63 = vadd.f32 %v3474_v41, %v2056_v56  ;;  %v4321_v31 = vpop.f32.mrb[20].mxu1 }
 0x17a   : > { %v961_v0 = vpop.f32.mrb[21].mxu0  ;;  %v2191_v20 = vmul.f32 %v3477_v61, %v3477_v61  ;;  %v4323_v39 = vpop.f32.mrb[21].mxu1 }
 0x17b   : > { %v2058_v2 = vadd.f32 %v2057_v63, %v961_v0  ;;  %v2189_v3 = vmul.f32 %v961_v0, %v961_v0  ;;  %v2315_v4 = vadd.f32 %v2314_v60, %v2188_v59  ;;  %v3478_v5 = vpop.f32.mrb[22].mxu0  ;;  %v4325_v43 = vpop.f32.mrb[22].mxu1 }
 0x17c   : > { %v3042_v7 = vpack.c.bf16 %v3478_v5, %v3477_v61  ;;  %v964_v8 = vpop.f32.mrb[23].mxu0  ;;  %v2192_v24 = vmul.f32 %v3478_v5, %v3478_v5  ;;  %v4327_v50 = vpop.f32.mrb[23].mxu1  ;;  %v3202_v52 = vpack.c.bf16 %v4325_v43, %v4321_v31 }
 0x17d   : > { %v2316_v11 = vadd.f32 %v2315_v4, %v2189_v3  ;;  %v3037_v12 = vpack.c.bf16 %v964_v8, %v961_v0  ;;  %v2059_v13 = vadd.f32 %v2058_v2, %v964_v8  ;;  %v2190_v15 = vmul.f32 %v964_v8, %v964_v8 }
 0x17e   : > { %3314 = vst [vmem:[%s4237_s22 + $0x58] sm:$0xff] %v3042_v7   ;;  %v3197_v53 = vpack.c.bf16 %v4327_v50, %v4323_v39  ;;  %3346 = vst [vmem:[%s4237_s22 + $0x158] sm:$0xff] %v3202_v52  }
 0x17f   : > { %3313 = vst [vmem:[%s4237_s22 + $0x50] sm:$0xff] %v3037_v12   ;;  %v2060_v21 = vadd.f32 %v3477_v61, %v2059_v13  ;;  %v2317_v23 = vadd.f32 %v2316_v11, %v2190_v15 }
 0x180   : > { %3345 = vst [vmem:[%s4237_s22 + $0x150] sm:$0xff] %v3197_v53  }
 0x181   : > { %v2318_v26 = vadd.f32 %v2317_v23, %v2191_v20  ;;  %v3481_v27 = vpop.f32.mrb[24].mxu0  ;;  %v2061_v28 = vadd.f32 %v3478_v5, %v2060_v21  ;;  %v4337_v2 = vpop.f32.mrb[24].mxu1 }
 0x182   : > { %v977_v29 = vpop.f32.mrb[25].mxu0  ;;  %v2195_v55 = vmul.f32 %v3481_v27, %v3481_v27  ;;  %v4339_v8 = vpop.f32.mrb[25].mxu1 }
 0x183   : > { %v2062_v32 = vadd.f32 %v2061_v28, %v977_v29  ;;  %v2193_v34 = vmul.f32 %v977_v29, %v977_v29  ;;  %v2319_v35 = vadd.f32 %v2318_v26, %v2192_v24  ;;  %v3482_v37 = vpop.f32.mrb[26].mxu0  ;;  %v4341_v13 = vpop.f32.mrb[26].mxu1 }
 0x184   : > { %v3052_v40 = vpack.c.bf16 %v3482_v37, %v3481_v27  ;;  %v980_v41 = vpop.f32.mrb[27].mxu0  ;;  %v2196_v59 = vmul.f32 %v3482_v37, %v3482_v37  ;;  %v4343_v21 = vpop.f32.mrb[27].mxu1  ;;  %v3212_v23 = vpack.c.bf16 %v4341_v13, %v4337_v2 }
 0x185   : > { %v2320_v44 = vadd.f32 %v2319_v35, %v2193_v34  ;;  %v3047_v46 = vpack.c.bf16 %v980_v41, %v977_v29  ;;  %v2063_v47 = vadd.f32 %v2062_v32, %v980_v41  ;;  %v2194_v48 = vmul.f32 %v980_v41, %v980_v41 }
 0x186   : > { %3316 = vst [vmem:[%s4237_s22 + $0x68] sm:$0xff] %v3052_v40   ;;  %v3207_v24 = vpack.c.bf16 %v4343_v21, %v4339_v8  ;;  %3348 = vst [vmem:[%s4237_s22 + $0x168] sm:$0xff] %v3212_v23  }
 0x187   : > { %3315 = vst [vmem:[%s4237_s22 + $0x60] sm:$0xff] %v3047_v46   ;;  %v2064_v56 = vadd.f32 %v3481_v27, %v2063_v47  ;;  %v2321_v58 = vadd.f32 %v2320_v44, %v2194_v48 }
 0x188   : > { %3347 = vst [vmem:[%s4237_s22 + $0x160] sm:$0xff] %v3207_v24  }
 0x189   : > { %v2322_v60 = vadd.f32 %v2321_v58, %v2195_v55  ;;  %v3485_v61 = vpop.f32.mrb[28].mxu0  ;;  %v2065_v63 = vadd.f32 %v3482_v37, %v2064_v56  ;;  %v4353_v40 = vpop.f32.mrb[28].mxu1 }
 0x18a   : > { %v993_v0 = vpop.f32.mrb[29].mxu0  ;;  %v2199_v26 = vmul.f32 %v3485_v61, %v3485_v61  ;;  %v4355_v48 = vpop.f32.mrb[29].mxu1 }
 0x18b   : > { %v2066_v3 = vadd.f32 %v2065_v63, %v993_v0  ;;  %v2197_v4 = vmul.f32 %v993_v0, %v993_v0  ;;  %v2323_v5 = vadd.f32 %v2322_v60, %v2196_v59  ;;  %v3486_v7 = vpop.f32.mrb[30].mxu0  ;;  %v4357_v55 = vpop.f32.mrb[30].mxu1 }
 0x18c   : > { %v3062_v11 = vpack.c.bf16 %v3486_v7, %v3485_v61  ;;  %v996_v12 = vpop.f32.mrb[31].mxu0  ;;  %v2200_v29 = vmul.f32 %v3486_v7, %v3486_v7  ;;  %v3222_v63 = vpack.c.bf16 %v4357_v55, %v4353_v40 }
 0x18d   : > { %v2324_v15 = vadd.f32 %v2323_v5, %v2197_v4  ;;  %v3057_v18 = vpack.c.bf16 %v996_v12, %v993_v0  ;;  %v2067_v19 = vadd.f32 %v2066_v3, %v996_v12  ;;  %v2198_v20 = vmul.f32 %v996_v12, %v996_v12 }
 0x18e   : > { %3318 = vst [vmem:[%s4237_s22 + $0x78] sm:$0xff] %v3062_v11   ;;  %3350 = vst [vmem:[%s4237_s22 + $0x178] sm:$0xff] %v3222_v63  }
 0x18f   : > { %3317 = vst [vmem:[%s4237_s22 + $0x70] sm:$0xff] %v3057_v18   ;;  %v2068_v27 = vadd.f32 %v3485_v61, %v2067_v19  ;;  %v2325_v28 = vadd.f32 %v2324_v15, %v2198_v20  ;;  %v4359_v61 = vpop.f32.mrb[31].mxu1 }
 0x190   : > { %v3217_v0 = vpack.c.bf16 %v4359_v61, %v4355_v48 }
 0x191   : > { %v2326_v32 = vadd.f32 %v2325_v28, %v2199_v26  ;;  %v3489_v34 = vpop.f32.mrb[32].mxu0  ;;  %v2069_v35 = vadd.f32 %v3486_v7, %v2068_v27  ;;  %v4369_v19 = vpop.f32.mrb[32].mxu1 }
 0x192   : > { %v1009_v37 = vpop.f32.mrb[33].mxu0  ;;  %v2203_v3 = vmul.f32 %v3489_v34, %v3489_v34  ;;  %3349 = vst [vmem:[%s4237_s22 + $0x170] sm:$0xff] %v3217_v0   ;;  %v4371_v27 = vpop.f32.mrb[33].mxu1 }
 0x193   : > { %v2070_v41 = vadd.f32 %v2069_v35, %v1009_v37  ;;  %v2201_v44 = vmul.f32 %v1009_v37, %v1009_v37  ;;  %v2327_v46 = vadd.f32 %v2326_v32, %v2200_v29  ;;  %v3490_v47 = vpop.f32.mrb[34].mxu0  ;;  %v4373_v32 = vpop.f32.mrb[34].mxu1 }
 0x194   : > { %v3072_v52 = vpack.c.bf16 %v3490_v47, %v3489_v34  ;;  %v1012_v53 = vpop.f32.mrb[35].mxu0  ;;  %v2204_v7 = vmul.f32 %v3490_v47, %v3490_v47 }
 0x195   : > { %v2328_v56 = vadd.f32 %v2327_v46, %v2201_v44  ;;  %v3067_v58 = vpack.c.bf16 %v1012_v53, %v1009_v37  ;;  %v2071_v59 = vadd.f32 %v2070_v41, %v1012_v53  ;;  %v2202_v60 = vmul.f32 %v1012_v53, %v1012_v53  ;;  %v4375_v44 = vpop.f32.mrb[35].mxu1 }
 0x196   : > { %3320 = vst [vmem:[%s4237_s22 + $0x88] sm:$0xff] %v3072_v52   ;;  %v3232_v46 = vpack.c.bf16 %v4373_v32, %v4369_v19 }
 0x197   : > { %3319 = vst [vmem:[%s4237_s22 + $0x80] sm:$0xff] %v3067_v58   ;;  %v2072_v4 = vadd.f32 %v3489_v34, %v2071_v59  ;;  %v2329_v5 = vadd.f32 %v2328_v56, %v2202_v60 }
 0x198   : > { %3352 = vst [vmem:[%s4237_s22 + $0x188] sm:$0xff] %v3232_v46  }
 0x199   : > { %v2330_v11 = vadd.f32 %v2329_v5, %v2203_v3  ;;  %v3493_v12 = vpop.f32.mrb[36].mxu0  ;;  %v2073_v15 = vadd.f32 %v3490_v47, %v2072_v4  ;;  %v3227_v47 = vpack.c.bf16 %v4375_v44, %v4371_v27  ;;  %v4385_v3 = vpop.f32.mrb[36].mxu1 }
 0x19a   : > { %v1025_v18 = vpop.f32.mrb[37].mxu0  ;;  %v2207_v52 = vmul.f32 %v3493_v12, %v3493_v12 }
 0x19b   : > { %v2074_v20 = vadd.f32 %v2073_v15, %v1025_v18  ;;  %v2205_v23 = vmul.f32 %v1025_v18, %v1025_v18  ;;  %v2331_v24 = vadd.f32 %v2330_v11, %v2204_v7  ;;  %v3494_v26 = vpop.f32.mrb[38].mxu0  ;;  %3351 = vst [vmem:[%s4237_s22 + $0x180] sm:$0xff] %v3227_v47   ;;  %v4387_v15 = vpop.f32.mrb[37].mxu1 }
 0x19c   : > { %v3082_v28 = vpack.c.bf16 %v3494_v26, %v3493_v12  ;;  %v1028_v29 = vpop.f32.mrb[39].mxu0  ;;  %v2208_v58 = vmul.f32 %v3494_v26, %v3494_v26 }
 0x19d   : > { %v2332_v34 = vadd.f32 %v2331_v24, %v2205_v23  ;;  %v3077_v35 = vpack.c.bf16 %v1028_v29, %v1025_v18  ;;  %v2075_v37 = vadd.f32 %v2074_v20, %v1028_v29  ;;  %v2206_v41 = vmul.f32 %v1028_v29, %v1028_v29  ;;  %v4389_v20 = vpop.f32.mrb[38].mxu1 }
 0x19e   : > { %3322 = vst [vmem:[%s4237_s22 + $0x98] sm:$0xff] %v3082_v28   ;;  %v4391_v29 = vpop.f32.mrb[39].mxu1 }
 0x19f   : > { %3321 = vst [vmem:[%s4237_s22 + $0x90] sm:$0xff] %v3077_v35   ;;  %v2076_v53 = vadd.f32 %v3493_v12, %v2075_v37  ;;  %v2333_v56 = vadd.f32 %v2332_v34, %v2206_v41  ;;  %v3242_v34 = vpack.c.bf16 %v4389_v20, %v4385_v3  ;;  %v3237_v35 = vpack.c.bf16 %v4391_v29, %v4387_v15 }
 0x1a1   : > { %v2334_v59 = vadd.f32 %v2333_v56, %v2207_v52  ;;  %v3497_v60 = vpop.f32.mrb[40].mxu0  ;;  %v2077_v63 = vadd.f32 %v3494_v26, %v2076_v53  ;;  %3354 = vst [vmem:[%s4237_s22 + $0x198] sm:$0xff] %v3242_v34   ;;  %3353 = vst [vmem:[%s4237_s22 + $0x190] sm:$0xff] %v3237_v35  }
 0x1a2   : > { %v1041_v0 = vpop.f32.mrb[41].mxu0  ;;  %v2211_v37 = vmul.f32 %v3497_v60, %v3497_v60 }
 0x1a3   : > { %v2078_v4 = vadd.f32 %v2077_v63, %v1041_v0  ;;  %v2209_v5 = vmul.f32 %v1041_v0, %v1041_v0  ;;  %v2335_v7 = vadd.f32 %v2334_v59, %v2208_v58  ;;  %v3498_v11 = vpop.f32.mrb[42].mxu0  ;;  %v4401_v59 = vpop.f32.mrb[40].mxu1 }
 0x1a4   : > { %v3092_v12 = vpack.c.bf16 %v3498_v11, %v3497_v60  ;;  %v1044_v18 = vpop.f32.mrb[43].mxu0  ;;  %v2212_v47 = vmul.f32 %v3498_v11, %v3498_v11  ;;  %4863 = vst [vmem:[#allocation15_spill] sm:$0xff] %v4401_v59 }
 0x1a5   : > { %v2336_v23 = vadd.f32 %v2335_v7, %v2209_v5  ;;  %v3087_v24 = vpack.c.bf16 %v1044_v18, %v1041_v0  ;;  %v2079_v26 = vadd.f32 %v2078_v4, %v1044_v18  ;;  %v2210_v28 = vmul.f32 %v1044_v18, %v1044_v18  ;;  %v4403_v7 = vpop.f32.mrb[41].mxu1 }
 0x1a6   : > { %3324 = vst [vmem:[%s4237_s22 + $0xa8] sm:$0xff] %v3092_v12   ;;  %v4405_v18 = vpop.f32.mrb[42].mxu1 }
 0x1a7   : > { %3323 = vst [vmem:[%s4237_s22 + $0xa0] sm:$0xff] %v3087_v24   ;;  %v2080_v41 = vadd.f32 %v3497_v60, %v2079_v26  ;;  %v2337_v46 = vadd.f32 %v2336_v23, %v2210_v28  ;;  %4864 = vst [vmem:[#allocation16_spill] sm:$0xff] %v4405_v18  ;;  %v4407_v28 = vpop.f32.mrb[43].mxu1  ;;  %v3252_v34 = vpack.c.bf16 %v4405_v18, %v4401_v59 }
 0x1a8   : > { %4865 = vst [vmem:[#allocation17_spill] sm:$0xff] %v4407_v28  ;;  %v3247_v35 = vpack.c.bf16 %v4407_v28, %v4403_v7 }
 0x1a9   : > { %v2338_v52 = vadd.f32 %v2337_v46, %v2211_v37  ;;  %v3501_v53 = vpop.f32.mrb[44].mxu0  ;;  %v2081_v56 = vadd.f32 %v3498_v11, %v2080_v41  ;;  %3356 = vst [vmem:[%s4237_s22 + $0x1a8] sm:$0xff] %v3252_v34  }
 0x1aa   : > { %v1057_v58 = vpop.f32.mrb[45].mxu0  ;;  %v2215_v37 = vmul.f32 %v3501_v53, %v3501_v53  ;;  %3355 = vst [vmem:[%s4237_s22 + $0x1a0] sm:$0xff] %v3247_v35  }
 0x1ab   : > { %v2082_v63 = vadd.f32 %v2081_v56, %v1057_v58  ;;  %v2213_v0 = vmul.f32 %v1057_v58, %v1057_v58  ;;  %v2339_v4 = vadd.f32 %v2338_v52, %v2212_v47  ;;  %v3502_v5 = vpop.f32.mrb[46].mxu0 }
 0x1ac   : > { %v3102_v60 = vpack.c.bf16 %v3502_v5, %v3501_v53  ;;  %v1060_v12 = vpop.f32.mrb[47].mxu0  ;;  %v2216_v47 = vmul.f32 %v3502_v5, %v3502_v5 }
 0x1ad   : > { %v2340_v23 = vadd.f32 %v2339_v4, %v2213_v0  ;;  %v3097_v24 = vpack.c.bf16 %v1060_v12, %v1057_v58  ;;  %v2083_v11 = vadd.f32 %v2082_v63, %v1060_v12  ;;  %v2214_v26 = vmul.f32 %v1060_v12, %v1060_v12  ;;  %v4417_v0 = vpop.f32.mrb[44].mxu1 }
 0x1ae   : > { %3326 = vst [vmem:[%s4237_s22 + $0xb8] sm:$0xff] %v3102_v60   ;;  %4866 = vst [vmem:[#allocation18_spill] sm:$0xff] %v4417_v0  ;;  %v4419_v59 = vpop.f32.mrb[45].mxu1 }
 0x1af   : > { %3325 = vst [vmem:[%s4237_s22 + $0xb0] sm:$0xff] %v3097_v24   ;;  %v2084_v41 = vadd.f32 %v3501_v53, %v2083_v11  ;;  %v2341_v46 = vadd.f32 %v2340_v23, %v2214_v26  ;;  %4867 = vst [vmem:[#allocation19_spill] sm:$0xff] %v4419_v59  ;;  %v4421_v24 = vpop.f32.mrb[46].mxu1 }
 0x1b0   : > { %4868 = vst [vmem:[#allocation20_spill] sm:$0xff] %v4421_v24  ;;  %v4423_v35 = vpop.f32.mrb[47].mxu1 }
 0x1b1   : > { %v2342_v52 = vadd.f32 %v2341_v46, %v2215_v37  ;;  %v3505_v56 = vpop.f32.mrb[48].mxu0  ;;  %v2085_v58 = vadd.f32 %v3502_v5, %v2084_v41  ;;  %4869 = vst [vmem:[#allocation21_spill] sm:$0xff] %v4423_v35  ;;  %v3262_v37 = vpack.c.bf16 %v4421_v24, %v4417_v0  ;;  %v3257_v41 = vpack.c.bf16 %v4423_v35, %v4419_v59 }
 0x1b2   : > { %v1073_v63 = vpop.f32.mrb[49].mxu0  ;;  %v2219_v46 = vmul.f32 %v3505_v56, %v3505_v56 }
 0x1b3   : > { %v2086_v4 = vadd.f32 %v2085_v58, %v1073_v63  ;;  %v2217_v60 = vmul.f32 %v1073_v63, %v1073_v63  ;;  %v2343_v12 = vadd.f32 %v2342_v52, %v2216_v47  ;;  %v3506_v18 = vpop.f32.mrb[50].mxu0  ;;  %3358 = vst [vmem:[%s4237_s22 + $0x1b8] sm:$0xff] %v3262_v37   ;;  %3357 = vst [vmem:[%s4237_s22 + $0x1b0] sm:$0xff] %v3257_v41  }
 0x1b4   : > { %v3112_v53 = vpack.c.bf16 %v3506_v18, %v3505_v56  ;;  %v1076_v23 = vpop.f32.mrb[51].mxu0  ;;  %v2220_v58 = vmul.f32 %v3506_v18, %v3506_v18 }
 0x1b5   : > { %v2344_v11 = vadd.f32 %v2343_v12, %v2217_v60  ;;  %v3107_v26 = vpack.c.bf16 %v1076_v23, %v1073_v63  ;;  %v2087_v5 = vadd.f32 %v2086_v4, %v1076_v23  ;;  %v2218_v34 = vmul.f32 %v1076_v23, %v1076_v23  ;;  %v4433_v23 = vpop.f32.mrb[48].mxu1 }
 0x1b6   : > { %3328 = vst [vmem:[%s4237_s22 + $0xc8] sm:$0xff] %v3112_v53   ;;  %4870 = vst [vmem:[#allocation22_spill] sm:$0xff] %v4433_v23  ;;  %v4435_v35 = vpop.f32.mrb[49].mxu1 }
 0x1b7   : > { %3327 = vst [vmem:[%s4237_s22 + $0xc0] sm:$0xff] %v3107_v26   ;;  %v2088_v47 = vadd.f32 %v3505_v56, %v2087_v5  ;;  %v2345_v52 = vadd.f32 %v2344_v11, %v2218_v34  ;;  %4871 = vst [vmem:[#allocation23_spill] sm:$0xff] %v4435_v35  ;;  %v4437_v26 = vpop.f32.mrb[50].mxu1 }
 0x1b8   : > { %4872 = vst [vmem:[#allocation24_spill] sm:$0xff] %v4437_v26  ;;  %v4439_v41 = vpop.f32.mrb[51].mxu1 }
 0x1b9   : > { %v2346_v60 = vadd.f32 %v2345_v52, %v2219_v46  ;;  %v3509_v63 = vpop.f32.mrb[52].mxu0  ;;  %v2089_v4 = vadd.f32 %v3506_v18, %v2088_v47  ;;  %4873 = vst [vmem:[#allocation25_spill] sm:$0xff] %v4439_v41  ;;  %v3272_v46 = vpack.c.bf16 %v4437_v26, %v4433_v23  ;;  %v3267_v47 = vpack.c.bf16 %v4439_v41, %v4435_v35 }
 0x1ba   : > { %v1089_v12 = vpop.f32.mrb[53].mxu0  ;;  %v2223_v52 = vmul.f32 %v3509_v63, %v3509_v63 }
 0x1bb   : > { %v2090_v53 = vadd.f32 %v2089_v4, %v1089_v12  ;;  %v2221_v28 = vmul.f32 %v1089_v12, %v1089_v12  ;;  %v2347_v24 = vadd.f32 %v2346_v60, %v2220_v58  ;;  %v3510_v0 = vpop.f32.mrb[54].mxu0  ;;  %3360 = vst [vmem:[%s4237_s22 + $0x1c8] sm:$0xff] %v3272_v46   ;;  %3359 = vst [vmem:[%s4237_s22 + $0x1c0] sm:$0xff] %v3267_v47  }
 0x1bc   : > { %v3122_v56 = vpack.c.bf16 %v3510_v0, %v3509_v63  ;;  %v1092_v11 = vpop.f32.mrb[55].mxu0  ;;  %v2224_v4 = vmul.f32 %v3510_v0, %v3510_v0 }
 0x1bd   : > { %v2348_v5 = vadd.f32 %v2347_v24, %v2221_v28  ;;  %v3117_v34 = vpack.c.bf16 %v1092_v11, %v1089_v12  ;;  %v2091_v18 = vadd.f32 %v2090_v53, %v1092_v11  ;;  %v2222_v37 = vmul.f32 %v1092_v11, %v1092_v11  ;;  %v4449_v11 = vpop.f32.mrb[52].mxu1 }
 0x1be   : > { %3330 = vst [vmem:[%s4237_s22 + $0xd8] sm:$0xff] %v3122_v56   ;;  %4874 = vst [vmem:[#allocation26_spill] sm:$0xff] %v4449_v11  ;;  %v4451_v41 = vpop.f32.mrb[53].mxu1 }
 0x1bf   : > { %3329 = vst [vmem:[%s4237_s22 + $0xd0] sm:$0xff] %v3117_v34   ;;  %v2092_v58 = vadd.f32 %v3509_v63, %v2091_v18  ;;  %v2349_v60 = vadd.f32 %v2348_v5, %v2222_v37  ;;  %v4453_v34 = vpop.f32.mrb[54].mxu1 }
 0x1c0   : > { %4875 = vst [vmem:[#allocation27_spill] sm:$0xff] %v4453_v34  ;;  %v4455_v47 = vpop.f32.mrb[55].mxu1 }
 0x1c1   : > { %v2350_v28 = vadd.f32 %v2349_v60, %v2223_v52  ;;  %v3513_v24 = vpop.f32.mrb[56].mxu0  ;;  %v2093_v12 = vadd.f32 %v3510_v0, %v2092_v58  ;;  %4876 = vst [vmem:[#allocation28_spill] sm:$0xff] %v4455_v47  ;;  %v3282_v52 = vpack.c.bf16 %v4453_v34, %v4449_v11  ;;  %v3277_v58 = vpack.c.bf16 %v4455_v47, %v4451_v41 }
 0x1c2   : > { %v1105_v53 = vpop.f32.mrb[57].mxu0  ;;  %v2227_v60 = vmul.f32 %v3513_v24, %v3513_v24 }
 0x1c3   : > { %v2094_v56 = vadd.f32 %v2093_v12, %v1105_v53  ;;  %v2225_v59 = vmul.f32 %v1105_v53, %v1105_v53  ;;  %v2351_v26 = vadd.f32 %v2350_v28, %v2224_v4  ;;  %v3514_v23 = vpop.f32.mrb[58].mxu0  ;;  %3362 = vst [vmem:[%s4237_s22 + $0x1d8] sm:$0xff] %v3282_v52   ;;  %3361 = vst [vmem:[%s4237_s22 + $0x1d0] sm:$0xff] %v3277_v58  }
 0x1c4   : > { %v3132_v63 = vpack.c.bf16 %v3514_v23, %v3513_v24  ;;  %v1108_v5 = vpop.f32.mrb[59].mxu0  ;;  %v2228_v12 = vmul.f32 %v3514_v23, %v3514_v23 }
 0x1c5   : > { %v2352_v18 = vadd.f32 %v2351_v26, %v2225_v59  ;;  %v3127_v37 = vpack.c.bf16 %v1108_v5, %v1105_v53  ;;  %v2095_v0 = vadd.f32 %v2094_v56, %v1108_v5  ;;  %v2226_v46 = vmul.f32 %v1108_v5, %v1108_v5  ;;  %v4465_v5 = vpop.f32.mrb[56].mxu1 }
 0x1c6   : > { %3332 = vst [vmem:[%s4237_s22 + $0xe8] sm:$0xff] %v3132_v63   ;;  %v4467_v47 = vpop.f32.mrb[57].mxu1 }
 0x1c7   : > { %3331 = vst [vmem:[%s4237_s22 + $0xe0] sm:$0xff] %v3127_v37   ;;  %v2096_v4 = vadd.f32 %v3513_v24, %v2095_v0  ;;  %v2353_v28 = vadd.f32 %v2352_v18, %v2226_v46  ;;  %v4469_v37 = vpop.f32.mrb[58].mxu1 }
 0x1c8   : > { %4877 = vst [vmem:[#allocation29_spill] sm:$0xff] %v4469_v37  ;;  %v4471_v58 = vpop.f32.mrb[59].mxu1 }
 0x1c9   : > { %v2354_v59 = vadd.f32 %v2353_v28, %v2227_v60  ;;  %v3517_v26 = vpop.f32.mrb[60].mxu0  ;;  %v2097_v53 = vadd.f32 %v3514_v23, %v2096_v4  ;;  %v3292_v60 = vpack.c.bf16 %v4469_v37, %v4465_v5  ;;  %v3287_v4 = vpack.c.bf16 %v4471_v58, %v4467_v47 }
 0x1ca   : > { %v1121_v56 = vpop.f32.mrb[61].mxu0  ;;  %v2231_v28 = vmul.f32 %v3517_v26, %v3517_v26 }
 0x1cb   : > { %v2098_v63 = vadd.f32 %v2097_v53, %v1121_v56  ;;  %v2229_v35 = vmul.f32 %v1121_v56, %v1121_v56  ;;  %v2355_v34 = vadd.f32 %v2354_v59, %v2228_v12  ;;  %v3518_v11 = vpop.f32.mrb[62].mxu0  ;;  %3364 = vst [vmem:[%s4237_s22 + $0x1e8] sm:$0xff] %v3292_v60   ;;  %3363 = vst [vmem:[%s4237_s22 + $0x1e0] sm:$0xff] %v3287_v4  }
 0x1cc   : > { %v3142_v24 = vpack.c.bf16 %v3518_v11, %v3517_v26  ;;  %v1124_v18 = vpop.f32.mrb[63].mxu0  ;;  %v2232_v53 = vmul.f32 %v3518_v11, %v3518_v11  ;;  %v2235_v60 = vmul.f32 %v4241_v25, %v4241_v25 }
 0x1cd   : > { %v2356_v0 = vadd.f32 %v2355_v34, %v2229_v35  ;;  %v3137_v46 = vpack.c.bf16 %v1124_v18, %v1121_v56  ;;  %v2099_v23 = vadd.f32 %v2098_v63, %v1124_v18  ;;  %v2230_v52 = vmul.f32 %v1124_v18, %v1124_v18  ;;  %v4483_v63 = vpop.f32.mrb[60].mxu1 }
 0x1ce   : > { %3334 = vst [vmem:[%s4237_s22 + $0xf8] sm:$0xff] %v3142_v24   ;;  %v2233_v56 = vmul.f32 %v4243_v30, %v4243_v30  ;;  %v4486_v37 = vpop.f32.mrb[61].mxu1 }
 0x1cf   : > { %3333 = vst [vmem:[%s4237_s22 + $0xf0] sm:$0xff] %v3137_v46   ;;  %v2100_v12 = vadd.f32 %v3517_v26, %v2099_v23  ;;  %v2357_v59 = vadd.f32 %v2356_v0, %v2230_v52  ;;  %v4488_v46 = vpop.f32.mrb[62].mxu1  ;;  %v2234_v0 = vmul.f32 %v4247_v38, %v4247_v38 }
 0x1d0   : > { %v3302_v23 = vpack.c.bf16 %v4488_v46, %v4483_v63  ;;  %v4495_v52 = vpop.f32.mrb[63].mxu1 }
 0x1d1   : > { %v2101_v35 = vadd.f32 %v3518_v11, %v2100_v12  ;;  %v2358_v34 = vadd.f32 %v2357_v59, %v2231_v28 }
 0x1d2   : > { %3366 = vst [vmem:[%s4237_s22 + $0x1f8] sm:$0xff] %v3302_v23  }
 0x1d3   : > { %v2359_v24 = vadd.f32 %v2358_v34, %v2232_v53  ;;  %v2102_v18 = vadd.f32 %v2101_v35, %v4243_v30  ;;  %v3297_v30 = vpack.c.bf16 %v4495_v52, %v4486_v37  ;;  %v2237_v53 = vmul.f32 %v4259_v54, %v4259_v54 }
 0x1d5   : > { %v2360_v26 = vadd.f32 %v2359_v24, %v2233_v56  ;;  %v2103_v11 = vadd.f32 %v2102_v18, %v4247_v38  ;;  %3365 = vst [vmem:[%s4237_s22 + $0x1f0] sm:$0xff] %v3297_v30   ;;  %v2236_v38 = vmul.f32 %v4245_v33, %v4245_v33 }
 0x1d7   : > { %v2104_v4 = vadd.f32 %v4241_v25, %v2103_v11  ;;  %v2361_v28 = vadd.f32 %v2360_v26, %v2234_v0 }
 0x1d9   : > { %v2362_v12 = vadd.f32 %v2361_v28, %v2235_v60  ;;  %v2105_v59 = vadd.f32 %v4245_v33, %v2104_v4 }
 0x1db   : > { %v2106_v25 = vadd.f32 %v2105_v59, %v4259_v54  ;;  %v2363_v35 = vadd.f32 %v2362_v12, %v2236_v38 }
 0x1dc   : > { %3830 = shalt.err (!%p3827_p9)
}
 0x1dd   : > { %s3831_s5 = scalar_lea.hbm %s4514_s14, 8192  ;;  %s3835_s22 = scalar_lea.hbm %s4814_s2, 16384 }
 0x1de   : > { %p3832_p1 = scmp.ne.s32.totalorder %s4514_s14, %s3831_s5  ;;  %p3836_p7 = scmp.lt.u32.totalorder %s4514_s14, %s4814_s2 }
 0x1df   : > { %p3837_p13 = scmp.lt.u32.totalorder %s3835_s22, %s3831_s5  ;;  %p3839_p6 = scmp.lt.u32.totalorder %s3831_s5, %s4514_s14 }
 0x1e0   : > { %p3833_p2 = pnand %p3832_p1, %p4096_p10 }
 0x1e1   : > { %p3838_p4 = por %p3837_p13, %p3836_p7 }
 0x1e2   : > { %p3834_p3 = pneg %p3833_p2 }
 0x1e3   : > { %p3840_p8 = por %p3839_p6, %p3838_p4 }
 0x1e5   : > { %p3841_p12 = pnand %p3840_p8, %p3834_p3 }
 0x1e7   : > { %3844 = shalt.err (!%p3841_p12)
}
 0x1e8   : > { %s3970_s13 = smov 64   ;;  %s3971_s27 = smov 4   ;;  %v2364_v33 = vadd.f32 %v2363_v35, %v2237_v53  ;;  %v2107_v54 = vadd.f32 %v2106_v25, %v4263_v62  ;;  %v2238_v34 = vmul.f32 %v4263_v62, %v4263_v62  ;;  %v2239_v56 = vmul.f32 %v4257_v49, %v4257_v49 }
 0x1e9   : > { %3605 = dma.vmem_to_hbm [thread:$0]  (%p4096_p10), %s4516_s25, 8192, %s4514_s14, %s2427_s30, %s3970_s13, %s3970_s13, %s3971_s27   ;;  %v2240_v26 = vmul.f32 %v4261_v57, %v4261_v57  ;;  %v2241_v23 = vmul.f32 %v4275_v14, %v4275_v14  ;;  %v2242_v28 = vmul.f32 %v4279_v22, %v4279_v22 }
 0x1ea   : > { %v2108_v24 = vadd.f32 %v4257_v49, %v2107_v54  ;;  %v2365_v18 = vadd.f32 %v2364_v33, %v2238_v34  ;;  %v2243_v49 = vmul.f32 %v4273_v9, %v4273_v9  ;;  %v2246_v54 = vmul.f32 %v4295_v51, %v4295_v51  ;;  %s2643_s25 = sshll.u32 %s4155_s10, 3  ;;  %s2431_s14 = sand.u32 1, %s4030_s21  }
 0x1eb   : > { %s2850_s30 = sshll.u32 %s3955_s18, 7  ;;  %s258_s7 = scalar_lea.vmem [#allocation8], %s2643_s25 }
 0x1ec   : > { %v2366_v11 = vadd.f32 %v2365_v18, %v2239_v56  ;;  %v2109_v0 = vadd.f32 %v4261_v57, %v2108_v24  ;;  %v2244_v57 = vmul.f32 %v4277_v17, %v4277_v17  ;;  %s2467_s10 = sshll.u32 %s258_s7, 4  ;;  %s4723_s9 = scalar_lea.vmem [#allocation10], %s2643_s25  ;;  %s4731_s10 = int_to_ptr.vmem [resolvable:$true] %s2467_s10 }
 0x1ed   : > { %s2480_s11 = sshll.u32 %s4723_s9, 4  ;;  %s4729_s6 = scalar_lea.hbm %s4815_s3, %s2850_s30  ;;  %s4738_s11 = int_to_ptr.vmem [resolvable:$true] %s2480_s11 }
 0x1ee   : > { %v2110_v30 = vadd.f32 %v2109_v0, %v4275_v14  ;;  %v2367_v60 = vadd.f32 %v2366_v11, %v2240_v26  ;;  %v2245_v14 = vmul.f32 %v4291_v42, %v4291_v42  ;;  %s4736_s22 = scalar_lea.hbm %s4816_s4, %s2850_s30  ;;  %s4740_s23 = scalar_lea.sflag [#allocation9], %s2431_s14 }
 0x1ef   : > { %s3845_s12 = scalar_lea.vmem %s4731_s10, 128  ;;  %s3972_s13 = smov [#allocation8]  }
 0x1f0   : > { %v2368_v4 = vadd.f32 %v2367_v60, %v2241_v23  ;;  %v2111_v62 = vadd.f32 %v2110_v30, %v4279_v22  ;;  %v2250_v23 = vmul.f32 %v4311_v16, %v4311_v16  ;;  %p3846_p11 = scmp.ne.s32.totalorder %s4731_s10, %s3845_s12  ;;  %s3849_s27 = sshll.u32 %s3972_s13, 4  ;;  %s3850_s27 = int_to_ptr.vmem [resolvable:$false] %s3849_s27 }
 0x1f1   : > { %s3851_s25 = scalar_lea.vmem %s3850_s27, 256  ;;  %p3852_p9 = scmp.lt.s32.totalorder %s4731_s10, %s3850_s27 }
 0x1f2   : > { %v2112_v38 = vadd.f32 %v4273_v9, %v2111_v62  ;;  %v2369_v12 = vadd.f32 %v2368_v4, %v2242_v28  ;;  %v2247_v9 = vmul.f32 %v4289_v36, %v4289_v36  ;;  %p3847_p0 = pnand %p3846_p11, %p4096_p10  ;;  %p3853_p1 = scmp.lt.s32.totalorder %s3851_s25, %s3845_s12 }
 0x1f4   : > { %v2370_v59 = vadd.f32 %v2369_v12, %v2243_v49  ;;  %v2113_v53 = vadd.f32 %v4277_v17, %v2112_v38  ;;  %v2248_v17 = vmul.f32 %v4293_v45, %v4293_v45  ;;  %v2254_v12 = vmul.f32 %v4327_v50, %v4327_v50  ;;  %p3848_p5 = pneg %p3847_p0  ;;  %p3854_p2 = por %p3853_p1, %p3852_p9 }
 0x1f6   : > { %v2114_v25 = vadd.f32 %v2113_v53, %v4291_v42  ;;  %v2371_v35 = vadd.f32 %v2370_v59, %v2244_v57  ;;  %v2249_v42 = vmul.f32 %v4307_v6, %v4307_v6  ;;  %p3855_p3 = pnand %p3854_p2, %p3848_p5 }
 0x1f8   : > { %v2372_v33 = vadd.f32 %v2371_v35, %v2245_v14  ;;  %v2115_v22 = vadd.f32 %v2114_v25, %v4295_v51 }
 0x1fa   : > { %v2116_v34 = vadd.f32 %v4289_v36, %v2115_v22  ;;  %v2373_v56 = vadd.f32 %v2372_v33, %v2246_v54  ;;  %v2251_v36 = vmul.f32 %v4305_v1, %v4305_v1  ;;  %v2258_v22 = vmul.f32 %v4343_v21, %v4343_v21 }
 0x1fc   : > { %v2374_v24 = vadd.f32 %v2373_v56, %v2247_v9  ;;  %v2117_v18 = vadd.f32 %v4293_v45, %v2116_v34  ;;  %v2252_v45 = vmul.f32 %v4309_v10, %v4309_v10 }
 0x1fe   : > { %v2118_v26 = vadd.f32 %v2117_v18, %v4307_v6  ;;  %v2375_v11 = vadd.f32 %v2374_v24, %v2248_v17  ;;  %v2253_v6 = vmul.f32 %v4323_v39, %v4323_v39 }
 0x200   : > { %v2376_v0 = vadd.f32 %v2375_v11, %v2249_v42  ;;  %v2119_v51 = vadd.f32 %v2118_v26, %v4311_v16  ;;  %v2262_v42 = vmul.f32 %v4359_v61, %v4359_v61 }
 0x202   : > { %v2120_v30 = vadd.f32 %v4305_v1, %v2119_v51  ;;  %v2377_v60 = vadd.f32 %v2376_v0, %v2250_v23  ;;  %v2255_v1 = vmul.f32 %v4321_v31, %v4321_v31 }
 0x204   : > { %v2378_v4 = vadd.f32 %v2377_v60, %v2251_v36  ;;  %v2121_v62 = vadd.f32 %v4309_v10, %v2120_v30  ;;  %v2256_v10 = vmul.f32 %v4325_v43, %v4325_v43  ;;  %v2266_v60 = vmul.f32 %v4375_v44, %v4375_v44 }
 0x206   : > { %v2122_v28 = vadd.f32 %v2121_v62, %v4323_v39  ;;  %v2379_v49 = vadd.f32 %v2378_v4, %v2252_v45  ;;  %v2257_v39 = vmul.f32 %v4339_v8, %v4339_v8 }
 0x208   : > { %v2380_v38 = vadd.f32 %v2379_v49, %v2253_v6  ;;  %v2123_v16 = vadd.f32 %v2122_v28, %v4327_v50 }
 0x20a   : > { %v2124_v57 = vadd.f32 %v4321_v31, %v2123_v16  ;;  %v2381_v59 = vadd.f32 %v2380_v38, %v2254_v12  ;;  %v2259_v31 = vmul.f32 %v4337_v2, %v4337_v2  ;;  %v2270_v16 = vmul.f32 %v4391_v29, %v4391_v29 }
 0x20c   : > { %v2382_v53 = vadd.f32 %v2381_v59, %v2255_v1  ;;  %v2125_v14 = vadd.f32 %v4325_v43, %v2124_v57  ;;  %v2260_v43 = vmul.f32 %v4341_v13, %v4341_v13 }
 0x20e   : > { %v2126_v25 = vadd.f32 %v2125_v14, %v4339_v8  ;;  %v2383_v35 = vadd.f32 %v2382_v53, %v2256_v10  ;;  %v2261_v8 = vmul.f32 %v4355_v48, %v4355_v48 }
 0x210   : > { %v2384_v33 = vadd.f32 %v2383_v35, %v2257_v39  ;;  %v2127_v50 = vadd.f32 %v2126_v25, %v4343_v21 }
 0x212   : > { %v2128_v54 = vadd.f32 %v4337_v2, %v2127_v50  ;;  %v2385_v9 = vadd.f32 %v2384_v33, %v2258_v22  ;;  %v2263_v2 = vmul.f32 %v4353_v40, %v4353_v40  ;;  %v4880_v22 = vld [vmem:[#allocation16_spill] sm:$0xff] }
 0x214   : > { %v2386_v34 = vadd.f32 %v2385_v9, %v2259_v31  ;;  %v2129_v56 = vadd.f32 %v4341_v13, %v2128_v54  ;;  %v2264_v13 = vmul.f32 %v4357_v55, %v4357_v55 }
 0x216   : > { %v2130_v17 = vadd.f32 %v2129_v56, %v4355_v48  ;;  %v2387_v24 = vadd.f32 %v2386_v34, %v2260_v43  ;;  %v2265_v48 = vmul.f32 %v4371_v27, %v4371_v27 }
 0x218   : > { %v2388_v18 = vadd.f32 %v2387_v24, %v2261_v8  ;;  %v2131_v21 = vadd.f32 %v2130_v17, %v4359_v61  ;;  %v4882_v8 = vld [vmem:[#allocation21_spill] sm:$0xff] }
 0x219   : > { %v2278_v24 = vmul.f32 %v4882_v8, %v4882_v8 }
 0x21a   : > { %v2132_v26 = vadd.f32 %v4353_v40, %v2131_v21  ;;  %v2389_v11 = vadd.f32 %v2388_v18, %v2262_v42  ;;  %v2267_v40 = vmul.f32 %v4369_v19, %v4369_v19  ;;  %v4883_v18 = vld [vmem:[#allocation18_spill] sm:$0xff] }
 0x21b   : > { %v2279_v21 = vmul.f32 %v4883_v18, %v4883_v18 }
 0x21c   : > { %v2390_v0 = vadd.f32 %v2389_v11, %v2263_v2  ;;  %v2133_v51 = vadd.f32 %v4357_v55, %v2132_v26  ;;  %v2268_v55 = vmul.f32 %v4373_v32, %v4373_v32  ;;  %v4884_v26 = vld [vmem:[#allocation20_spill] sm:$0xff] }
 0x21d   : > { %v2280_v11 = vmul.f32 %v4884_v26, %v4884_v26 }
 0x21e   : > { %v2134_v23 = vadd.f32 %v2133_v51, %v4371_v27  ;;  %v2391_v36 = vadd.f32 %v2390_v0, %v2264_v13  ;;  %v2269_v27 = vmul.f32 %v4387_v15, %v4387_v15  ;;  %v4885_v51 = vld [vmem:[#allocation23_spill] sm:$0xff] }
 0x220   : > { %v2392_v30 = vadd.f32 %v2391_v36, %v2265_v48  ;;  %v2135_v61 = vadd.f32 %v2134_v23, %v4375_v44  ;;  %v2281_v48 = vmul.f32 %v4885_v51, %v4885_v51 }
 0x222   : > { %v2136_v45 = vadd.f32 %v4369_v19, %v2135_v61  ;;  %v2393_v4 = vadd.f32 %v2392_v30, %v2266_v60  ;;  %v2271_v19 = vmul.f32 %v4385_v3, %v4385_v3  ;;  %v4886_v61 = vld [vmem:[#allocation25_spill] sm:$0xff] }
 0x224   : > { %v2394_v62 = vadd.f32 %v2393_v4, %v2267_v40  ;;  %v2137_v6 = vadd.f32 %v4373_v32, %v2136_v45  ;;  %v2272_v32 = vmul.f32 %v4389_v20, %v4389_v20  ;;  %v2282_v40 = vmul.f32 %v4886_v61, %v4886_v61  ;;  %v4887_v45 = vld [vmem:[#allocation22_spill] sm:$0xff] }
 0x225   : > { %v2283_v4 = vmul.f32 %v4887_v45, %v4887_v45 }
 0x226   : > { %v2138_v28 = vadd.f32 %v2137_v6, %v4387_v15  ;;  %v2395_v49 = vadd.f32 %v2394_v62, %v2268_v55  ;;  %v2273_v15 = vmul.f32 %v4403_v7, %v4403_v7  ;;  %v4888_v6 = vld [vmem:[#allocation24_spill] sm:$0xff] }
 0x228   : > { %v2396_v38 = vadd.f32 %v2395_v49, %v2269_v27  ;;  %v2139_v44 = vadd.f32 %v2138_v28, %v4391_v29  ;;  %v4878_v29 = vld [vmem:[#allocation17_spill] sm:$0xff]  ;;  %v2284_v27 = vmul.f32 %v4888_v6, %v4888_v6 }
 0x229   : > { %v2274_v25 = vmul.f32 %v4878_v29, %v4878_v29 }
 0x22a   : > { %v2140_v12 = vadd.f32 %v4385_v3, %v2139_v44  ;;  %v2397_v1 = vadd.f32 %v2396_v38, %v2270_v16  ;;  %v4879_v3 = vld [vmem:[#allocation15_spill] sm:$0xff]  ;;  %v2285_v38 = vmul.f32 %v4451_v41, %v4451_v41 }
 0x22b   : > { %v2275_v35 = vmul.f32 %v4879_v3, %v4879_v3 }
 0x22c   : > { %v2398_v57 = vadd.f32 %v2397_v1, %v2271_v19  ;;  %v2141_v59 = vadd.f32 %v4389_v20, %v2140_v12  ;;  %v2276_v20 = vmul.f32 %v4880_v22, %v4880_v22  ;;  %v4889_v12 = vld [vmem:[#allocation28_spill] sm:$0xff] }
 0x22e   : > { %v2142_v10 = vadd.f32 %v2141_v59, %v4403_v7  ;;  %v2399_v53 = vadd.f32 %v2398_v57, %v2272_v32  ;;  %v4881_v7 = vld [vmem:[#allocation19_spill] sm:$0xff]  ;;  %v2286_v32 = vmul.f32 %v4889_v12, %v4889_v12  ;;  %v4890_v57 = vld [vmem:[#allocation26_spill] sm:$0xff] }
 0x22f   : > { %v2277_v9 = vmul.f32 %v4881_v7, %v4881_v7  ;;  %v2287_v59 = vmul.f32 %v4890_v57, %v4890_v57 }
 0x230   : > { %v2400_v14 = vadd.f32 %v2399_v53, %v2273_v15  ;;  %v2143_v39 = vadd.f32 %v2142_v10, %v4878_v29  ;;  %v4891_v53 = vld [vmem:[#allocation27_spill] sm:$0xff] }
 0x232   : > { %v2144_v33 = vadd.f32 %v4879_v3, %v2143_v39  ;;  %v2401_v50 = vadd.f32 %v2400_v14, %v2274_v25  ;;  %v2288_v14 = vmul.f32 %v4891_v53, %v4891_v53  ;;  %v2289_v39 = vmul.f32 %v4467_v47, %v4467_v47 }
 0x234   : > { %v2402_v31 = vadd.f32 %v2401_v50, %v2275_v35  ;;  %v2145_v54 = vadd.f32 %v4880_v22, %v2144_v33  ;;  %v2290_v50 = vmul.f32 %v4471_v58, %v4471_v58  ;;  %v2291_v22 = vmul.f32 %v4465_v5, %v4465_v5 }
 0x236   : > { %v2146_v43 = vadd.f32 %v2145_v54, %v4881_v7  ;;  %v2403_v34 = vadd.f32 %v2402_v31, %v2276_v20  ;;  %v4892_v54 = vld [vmem:[#allocation29_spill] sm:$0xff] }
 0x237   : > { %v2292_v7 = vmul.f32 %v4892_v54, %v4892_v54 }
 0x238   : > { %v2404_v56 = vadd.f32 %v2403_v34, %v2277_v9  ;;  %v2147_v17 = vadd.f32 %v2146_v43, %v4882_v8  ;;  %v2293_v43 = vmul.f32 %v4486_v37, %v4486_v37 }
 0x23a   : > { %v2148_v42 = vadd.f32 %v4883_v18, %v2147_v17  ;;  %v2405_v2 = vadd.f32 %v2404_v56, %v2278_v24  ;;  %v2295_v17 = vmul.f32 %v4483_v63, %v4483_v63 }
 0x23c   : > { %v2406_v13 = vadd.f32 %v2405_v2, %v2279_v21  ;;  %v2149_v0 = vadd.f32 %v4884_v26, %v2148_v42 }
 0x23e   : > { %v2150_v23 = vadd.f32 %v2149_v0, %v4885_v51  ;;  %v2407_v36 = vadd.f32 %v2406_v13, %v2280_v11 }
 0x240   : > { %v2408_v30 = vadd.f32 %v2407_v36, %v2281_v48  ;;  %v2151_v60 = vadd.f32 %v2150_v23, %v4886_v61 }
 0x242   : > { %v2152_v55 = vadd.f32 %v4887_v45, %v2151_v60  ;;  %v2409_v62 = vadd.f32 %v2408_v30, %v2282_v40 }
 0x244   : > { %v2410_v28 = vadd.f32 %v2409_v62, %v2283_v4  ;;  %v2153_v49 = vadd.f32 %v4888_v6, %v2152_v55 }
 0x246   : > { %v2154_v44 = vadd.f32 %v2153_v49, %v4451_v41  ;;  %v2411_v16 = vadd.f32 %v2410_v28, %v2284_v27 }
 0x248   : > { %v2412_v19 = vadd.f32 %v2411_v16, %v2285_v38  ;;  %v2155_v1 = vadd.f32 %v2154_v44, %v4889_v12 }
 0x24a   : > { %v2156_v15 = vadd.f32 %v4890_v57, %v2155_v1  ;;  %v2413_v10 = vadd.f32 %v2412_v19, %v2286_v32 }
 0x24c   : > { %v2414_v29 = vadd.f32 %v2413_v10, %v2287_v59  ;;  %v2157_v41 = vadd.f32 %v4891_v53, %v2156_v15 }
 0x24e   : > { %v2158_v25 = vadd.f32 %v2157_v41, %v4467_v47  ;;  %v2415_v3 = vadd.f32 %v2414_v29, %v2288_v14 }
 0x250   : > { %v2416_v35 = vadd.f32 %v2415_v3, %v2289_v39  ;;  %v2159_v33 = vadd.f32 %v2158_v25, %v4471_v58 }
 0x252   : > { %v2160_v20 = vadd.f32 %v4465_v5, %v2159_v33  ;;  %v2417_v31 = vadd.f32 %v2416_v35, %v2290_v50  ;;  %v2294_v5 = vmul.f32 %v4495_v52, %v4495_v52 }
 0x254   : > { %v2418_v9 = vadd.f32 %v2417_v31, %v2291_v22  ;;  %v2161_v47 = vadd.f32 %v4892_v54, %v2160_v20 }
 0x256   : > { %v2162_v58 = vadd.f32 %v2161_v47, %v4486_v37  ;;  %v2419_v34 = vadd.f32 %v2418_v9, %v2292_v7  ;;  %v2296_v37 = vmul.f32 %v4488_v46, %v4488_v46 }
 0x258   : > { %v2420_v56 = vadd.f32 %v2419_v34, %v2293_v43  ;;  %v2163_v8 = vadd.f32 %v2162_v58, %v4495_v52 }
 0x25a   : > { %v2164_v24 = vadd.f32 %v4483_v63, %v2163_v8  ;;  %v2421_v18 = vadd.f32 %v2420_v56, %v2294_v5 }
 0x25c   : > { %v2165_v21 = vadd.f32 %v4488_v46, %v2164_v24  ;;  %v2422_v42 = vadd.f32 %v2421_v18, %v2295_v17 }
 0x25e   : > { %v2423_v52 = vadd.f32 %v2422_v42, %v2296_v37  ;;  %2167 = vst [vmem:[%s258_s7] sm:$0xff] %v2165_v21 }
 0x25f   : > { %3858 = shalt.err (!%p3855_p3)
}
 0x260   : > { %s3859_s14 = scalar_lea.hbm %s4729_s6, 128  ;;  %s3863_s5 = scalar_lea.hbm %s4815_s3, 256 }
 0x261   : > { %p3860_p7 = scmp.ne.s32.totalorder %s4729_s6, %s3859_s14  ;;  %p3864_p6 = scmp.lt.u32.totalorder %s4729_s6, %s4815_s3 }
 0x262   : > { %p3865_p8 = scmp.lt.u32.totalorder %s3863_s5, %s3859_s14  ;;  %p3867_p11 = scmp.lt.u32.totalorder %s3859_s14, %s4729_s6 }
 0x263   : > { %p3861_p13 = pnand %p3860_p7, %p4096_p10 }
 0x264   : > { %p3866_p12 = por %p3865_p8, %p3864_p6 }
 0x265   : > { %p3862_p4 = pneg %p3861_p13 }
 0x266   : > { %p3868_p0 = por %p3867_p11, %p3866_p12 }
 0x268   : > { %p3869_p5 = pnand %p3868_p0, %p3862_p4 }
 0x26a   : > { %3872 = shalt.err (!%p3869_p5)
}
 0x26b   : > { %3606 = dma.vmem_to_hbm [thread:$0]  (%p4096_p10), %s4731_s10, 128, %s4729_s6, %s4740_s23   ;;  %2425 = vst [vmem:[%s4723_s9] sm:$0xff] %v2423_v52 }
 0x26c   : > { %s3873_s21 = scalar_lea.vmem %s4738_s11, 128  ;;  %s3973_s12 = smov [#allocation10]  }
 0x26d   : > { %p3874_p9 = scmp.ne.s32.totalorder %s4738_s11, %s3873_s21  ;;  %s3877_s13 = sshll.u32 %s3973_s12, 4  ;;  %s3878_s13 = int_to_ptr.vmem [resolvable:$false] %s3877_s13 }
 0x26e   : > { %s3879_s27 = scalar_lea.vmem %s3878_s13, 256  ;;  %p3880_p3 = scmp.lt.s32.totalorder %s4738_s11, %s3878_s13 }
 0x26f   : > { %p3875_p1 = pnand %p3874_p9, %p4096_p10  ;;  %p3881_p7 = scmp.lt.s32.totalorder %s3879_s27, %s3873_s21 }
 0x271   : > { %p3876_p2 = pneg %p3875_p1  ;;  %p3882_p13 = por %p3881_p7, %p3880_p3 }
 0x273   : > { %p3883_p4 = pnand %p3882_p13, %p3876_p2 }
 0x275   : > { %3886 = shalt.err (!%p3883_p4)
}
 0x276   : > { %s3887_s10 = scalar_lea.hbm %s4736_s22, 128  ;;  %s3891_s25 = scalar_lea.hbm %s4816_s4, 256 }
 0x277   : > { %p3888_p6 = scmp.ne.s32.totalorder %s4736_s22, %s3887_s10  ;;  %p3892_p11 = scmp.lt.u32.totalorder %s4736_s22, %s4816_s4 }
 0x278   : > { %p3893_p0 = scmp.lt.u32.totalorder %s3891_s25, %s3887_s10  ;;  %p3895_p9 = scmp.lt.u32.totalorder %s3887_s10, %s4736_s22 }
 0x279   : > { %p3889_p8 = pnand %p3888_p6, %p4096_p10 }
 0x27a   : > { %p3894_p5 = por %p3893_p0, %p3892_p11 }
 0x27b   : > { %p3890_p12 = pneg %p3889_p8 }
 0x27c   : > { %p3896_p1 = por %p3895_p9, %p3894_p5 }
 0x27e   : > { %p3897_p2 = pnand %p3896_p1, %p3890_p12 }
 0x280   : > { %3900 = shalt.err (!%p3897_p2)
}
 0x281   : > { %3607 = dma.vmem_to_hbm [thread:$0]  (%p4096_p10), %s4738_s11, 128, %s4736_s22, %s4740_s23  }
 0x282 PF: > { %s2492_s7 = sand.u32 1, %s3943_s15   ;;  %p4893_p3 = scmp.ne.s32.totalorder %s4852_s24, 0 }
 0x283   : > { %p4894_p7 = scmp.ge.s32.totalorder %s3963_s20, 2  ;;  %s2493_s5 = scalar_lea.sflag [#allocation4], %s2492_s7 }
 0x285   : > { %p3620_p13 = pnand %p4894_p7, %p4893_p3 }
 0x287   : > { %3934 = dma.done.wait (!%p3620_p13), %s2493_s5, 8192  }
 0x288   : > { %3936 = vsyncadd (!%p3620_p13), %s2493_s5, 4294959104  ;;  %s4895_s26 = sadd.s32 4294967294, %s3963_s20  }
 0x289   : > { %s2501_s18 = sand.u32 1, %s4895_s26  }
 0x28a   : > { %s2502_s21 = scalar_lea.sflag [#allocation9], %s2501_s18 }
 0x28b   : > { %3938 = dma.done.wait (!%p3620_p13), %s2502_s21, 256  }
 0x28c   : > { %3940 = vsyncadd (!%p3620_p13), %s2502_s21, 4294967040  ;;  %s25_s20 = sadd.s32 1, %s3963_s20   ;;  %s4896_s15 = smov %s3947_s16 }
 0x28d   : > { %p22_p10 = scmp.ge.s32.totalorder %s25_s20, 4   ;;  %s4897_s16 = smov %s3951_s17 }
 0x28e   : > { %s4898_s17 = smov %s4105_s8  ;;  %s4899_s18 = smov %s3959_s19 }
 0x28f   : > { %s4900_s19 = smov %s4902_s29  ;;  %24 = sbr.rel (!%p22_p10) target bundleno = 9 (0x9), region = 113 }
 0x296   :  { %2516 = vsyncpa [#allocation3], 1 }
 0x297   :  { %2518 = vsyncpa [#allocation3 + $0x1], 1 }
 0x298   :  { %2519 = vsyncpa [#allocation6], 1 }
 0x299   :  { %2520 = vsyncpa [#allocation4], 1 }
 0x29a   :  { %2522 = vsyncpa [#allocation4 + $0x1], 1 }
 0x29b   :  { %2523 = vsyncpa [#allocation9], 1 }
 0x29c   :  { %2525 = vsyncpa [#allocation9 + $0x1], 1 }

</bundles_post_ra>
